<compile_context>
chip_gen: v7x
topology: tpu7x:2x2x1
jax: 0.10.0
libtpu: 0.0.40
codegen_flags: <defaults>
</compile_context>

<pallas_src>
import functools
import math

import jax
import jax.numpy as jnp
from jax.experimental import pallas as pl
from jax.experimental.pallas import tpu as pltpu


# ----------------------------- small helpers --------------------------------

def _round_up(x, m):
    return ((x + m - 1) // m) * m


def _pick_tile(total, target):
    """Row tile along the packed-pixel axis.

    Returns (tile, padded_total): tile is either == padded_total (single tile) or a
    multiple of 8 dividing padded_total; padded_total >= total (pad + masked stats).
    """
    if total <= target:
        return total, total
    t = (target // 8) * 8
    while t >= 8:
        if total % t == 0:
            return t, total
        t -= 8
    t = (target // 8) * 8            # no clean divisor: pad rows, mask the stats
    return t, _round_up(total, t)


def _vmem_capacity_bytes():
    try:
        cap = int(pltpu.get_tpu_info().vmem_capacity_bytes)
        if cap > 0:
            return cap
    except Exception:
        pass
    return 64 * 1024 * 1024          # conservative default (v7x per-core VMEM)


# --------------------------- traced kernel helpers ---------------------------

def _accumulate_stats(c, t, mean_sc, m2_sc, *, tile_p, valid_rows, padded):
    """Streaming per-(pixel-slot, channel) mean/M2 over packed row tiles (Chan merge)."""
    if padded:
        rows = jax.lax.broadcasted_iota(jnp.int32, (c.shape[0], 1), 0) + t * tile_p
        msk = (rows < valid_rows).astype(jnp.float32)
        nb = jnp.minimum(tile_p, valid_rows - t * tile_p).astype(jnp.float32)
        tmean = jnp.sum(c * msk, axis=0, keepdims=True) / nb
        d = (c - tmean) * msk
    else:
        nb = jnp.float32(tile_p)
        tmean = jnp.sum(c, axis=0, keepdims=True) / nb
        d = c - tmean
    tm2 = jnp.sum(d * d, axis=0, keepdims=True)

    @pl.when(t == 0)
    def _():
        mean_sc[...] = tmean
        m2_sc[...] = tm2

    @pl.when(t > 0)
    def _():
        na = (t * tile_p).astype(jnp.float32)        # only the last tile can be padded
        ntot = na + nb
        delta = tmean - mean_sc[...]
        mean_sc[...] = mean_sc[...] + delta * (nb / ntot)
        m2_sc[...] = m2_sc[...] + tm2 + delta * delta * (na * nb / ntot)


def _scale_shift_packed(mean_row, m2_row, gbp, fold, *, g, rows_per_slot, total_px, eps):
    """Fold packed (slot, channel) stats into per-channel scale/shift, expanded back to
    the packed (1, g*Cout) lane layout via A = kron(ones(g,g), eye(Cout))."""
    mean_exp = jnp.dot(mean_row, fold, preferred_element_type=jnp.float32) / g
    m2_exp = jnp.dot(m2_row, fold, preferred_element_type=jnp.float32)
    dm = mean_row - mean_exp
    spread = jnp.dot(dm * dm, fold, preferred_element_type=jnp.float32)
    var = (m2_exp + rows_per_slot * spread) / total_px    # biased var (InstanceNorm2d)
    rstd = jax.lax.rsqrt(var + eps)
    scale = gbp[0:1, :] * rstd                            # gamma * rstd (packed lanes)
    shift = gbp[1:2, :] - mean_exp * scale                # beta - mean * scale
    return scale, shift


# --------------------------------- kernels -----------------------------------

def _fused_block_kernel(x_ref, w_ref, gbp_ref, fold_ref, o_ref,
                        plane_sc, mean_sc, m2_sc, ss_sc, *,
                        eps, slope, tile_p, valid_rows, padded, g,
                        rows_per_slot, total_px, n_tiles):
    """phase 0: conv tile -> VMEM plane + streaming stats (+ finalize scale/shift).
       phase 1: normalize + LeakyReLU from the resident plane (no HBM re-read)."""
    phase = pl.program_id(1)
    t = pl.program_id(2)
    idx = 0 if n_tiles == 1 else t           # static index when there is a single tile

    @pl.when(phase == 0)
    def _():
        c = jnp.dot(x_ref[...], w_ref[...], preferred_element_type=jnp.float32)
        plane_sc[idx] = c
        _accumulate_stats(c, t, mean_sc, m2_sc,
                          tile_p=tile_p, valid_rows=valid_rows, padded=padded)

        @pl.when(t == n_tiles - 1)
        def _():
            scale, shift = _scale_shift_packed(
                mean_sc[...], m2_sc[...], gbp_ref[...], fold_ref[...],
                g=g, rows_per_slot=rows_per_slot, total_px=total_px, eps=eps)
            ss_sc[0:1, :] = scale
            ss_sc[1:2, :] = shift

    @pl.when(phase == 1)
    def _():
        z = plane_sc[idx] * ss_sc[0:1, :] + ss_sc[1:2, :]
        o_ref[...] = jnp.where(z >= 0.0, z, z * slope).astype(o_ref.dtype)


def _stats_kernel(x_ref, w_ref, gbp_ref, fold_ref, ss_ref, mean_sc, m2_sc, *,
                  eps, tile_p, valid_rows, padded, g, rows_per_slot, total_px, n_tiles):
    """Fallback pass 1 (plane too large for VMEM): conv tile + streaming stats."""
    t = pl.program_id(1)
    c = jnp.dot(x_ref[...], w_ref[...], preferred_element_type=jnp.float32)
    _accumulate_stats(c, t, mean_sc, m2_sc,
                      tile_p=tile_p, valid_rows=valid_rows, padded=padded)

    @pl.when(t == n_tiles - 1)
    def _():
        scale, shift = _scale_shift_packed(
            mean_sc[...], m2_sc[...], gbp_ref[...], fold_ref[...],
            g=g, rows_per_slot=rows_per_slot, total_px=total_px, eps=eps)
        ss_ref[0:1, :] = scale
        ss_ref[1:2, :] = shift


def _apply_kernel(x_ref, w_ref, ss_ref, o_ref, *, slope):
    """Fallback pass 2: recompute conv tile + normalize + LeakyReLU (lane-dense)."""
    c = jnp.dot(x_ref[...], w_ref[...], preferred_element_type=jnp.float32)
    z = c * ss_ref[0:1, :] + ss_ref[1:2, :]
    o_ref[...] = jnp.where(z >= 0.0, z, z * slope).astype(o_ref.dtype)


# ------------------------------ block wrapper --------------------------------

def encoder_block_pallas(x_nhwc, w, b, gamma, beta, *, kernel_size, stride,
                         leaky_slope=0.3, eps=1e-5, compute_dtype=jnp.bfloat16,
                         out_dtype=jnp.float32, tile_rows=1024):
    """One EncoderBlock on a channels-last input: (N, H, W, Cin) -> (N, Ho, Wo, Cout)."""
    assert kernel_size == stride, "non-overlapping conv (kernel_size == stride) assumed"
    del b    # conv bias is cancelled exactly by InstanceNorm's mean subtraction
    K = kernel_size
    N, H, W_, Cin = x_nhwc.shape
    Cout = w.shape[0]
    Ho, Wo = (H - K) // K + 1, (W_ - K) // K + 1
    if Ho * K != H or Wo * K != W_:
        x_nhwc = x_nhwc[:, :Ho * K, :Wo * K, :]
    HWo = Ho * Wo
    Kc = K * K * Cin

    # ---- wrapper glue: patchify (channels-last, non-overlapping k == s) ----
    xp = x_nhwc.reshape(N, Ho, K, Wo, K, Cin)
    xp = jnp.transpose(xp, (0, 1, 3, 2, 4, 5)).reshape(N, HWo, Kc)
    wm = jnp.transpose(w, (2, 3, 1, 0)).reshape(Kc, Cout)     # (kh, kw, ci, co)

    Kc_pad = _round_up(Kc, 16)                                # sublane alignment
    if Kc_pad != Kc:
        xp = jnp.pad(xp, ((0, 0), (0, 0), (0, Kc_pad - Kc)))
        wm = jnp.pad(wm, ((0, Kc_pad - Kc), (0, 0)))

    # ---- lane-dense packing: g output pixels per row (minor dims become >=128) ----
    if Cout < 128 and 128 % Cout == 0:
        g = math.gcd(HWo, 128 // Cout)
    else:
        g = 1
    Rp = HWo // g
    gKc, gC = g * Kc_pad, g * Cout

    xp = xp.astype(compute_dtype).reshape(N, Rp, gKc)          # pure HBM view
    w_bd = jnp.kron(jnp.eye(g, dtype=jnp.float32),
                    wm.astype(jnp.float32)).astype(compute_dtype)   # block-diag weight
    gbp = jnp.concatenate(
        [jnp.tile(gamma.reshape(1, Cout).astype(jnp.float32), (1, g)),
         jnp.tile(beta.reshape(1, Cout).astype(jnp.float32), (1, g))], axis=0)
    fold = jnp.kron(jnp.ones((g, g), jnp.float32), jnp.eye(Cout, dtype=jnp.float32))

    # ---- row tiling (pad + masked stats when no clean divisor exists) ----
    in_isz = jnp.dtype(compute_dtype).itemsize
    out_isz = jnp.dtype(out_dtype).itemsize
    target_rows = max(8, min(int(tile_rows), (4 << 20) // max(1, gKc * in_isz)))
    tile_p, Rp_pad = _pick_tile(Rp, target_rows)
    n_tiles = Rp_pad // tile_p
    padded = Rp_pad != Rp
    if padded:
        xp = jnp.pad(xp, ((0, 0), (0, Rp_pad - Rp), (0, 0)))

    # ---- per-generation VMEM budget and fused-vs-recompute gate ----
    cap = _vmem_capacity_bytes()                       # 64 MiB (v7x) / 128 MiB (v5e/v6e)
    vmem_limit = min(int(cap * 0.75), 100 * 1024 * 1024)
    plane_bytes = n_tiles * tile_p * gC * 4
    pipeline_bytes = (2 * tile_p * (gKc * in_isz + gC * out_isz)
                      + 2 * gKc * gC * in_isz + gC * gC * 4 + (1 << 20))
    fuse = plane_bytes + pipeline_bytes <= int(vmem_limit * 0.7)

    stat_kw = dict(eps=float(eps), tile_p=tile_p, valid_rows=Rp, padded=padded,
                   g=g, rows_per_slot=float(Rp), total_px=float(HWo),
                   n_tiles=n_tiles)

    if fuse:
        kernel = functools.partial(_fused_block_kernel,
                                   slope=float(leaky_slope), **stat_kw)
        out = pl.pallas_call(
            kernel,
            out_shape=jax.ShapeDtypeStruct((N, Rp_pad, gC), out_dtype),
            grid=(N, 2, n_tiles),
            in_specs=[
                # pin the input block during phase 1 so no HBM re-read happens
                pl.BlockSpec((None, tile_p, gKc),
                             lambda n, p, t: (n, t * (1 - p) + (n_tiles - 1) * p, 0)),
                pl.BlockSpec((gKc, gC), lambda n, p, t: (0, 0)),
                pl.BlockSpec((2, gC), lambda n, p, t: (0, 0)),
                pl.BlockSpec((gC, gC), lambda n, p, t: (0, 0)),
            ],
            out_specs=pl.BlockSpec((None, tile_p, gC),
                                   lambda n, p, t: (n, t * p, 0)),
            scratch_shapes=[pltpu.VMEM((n_tiles, tile_p, gC), jnp.float32),
                            pltpu.VMEM((1, gC), jnp.float32),
                            pltpu.VMEM((1, gC), jnp.float32),
                            pltpu.VMEM((2, gC), jnp.float32)],
            compiler_params=pltpu.CompilerParams(
                dimension_semantics=("parallel", "arbitrary", "arbitrary"),
                vmem_limit_bytes=vmem_limit),
        )(xp, w_bd, gbp, fold)
    else:
        # Fallback: conv plane does not fit VMEM -> stats pass + recompute-apply pass.
        ss = pl.pallas_call(
            functools.partial(_stats_kernel, **stat_kw),
            out_shape=jax.ShapeDtypeStruct((N, 2, gC), jnp.float32),
            grid=(N, n_tiles),
            in_specs=[
                pl.BlockSpec((None, tile_p, gKc), lambda n, t: (n, t, 0)),
                pl.BlockSpec((gKc, gC), lambda n, t: (0, 0)),
                pl.BlockSpec((2, gC), lambda n, t: (0, 0)),
                pl.BlockSpec((gC, gC), lambda n, t: (0, 0)),
            ],
            out_specs=pl.BlockSpec((None, 2, gC), lambda n, t: (n, 0, 0)),
            scratch_shapes=[pltpu.VMEM((1, gC), jnp.float32),
                            pltpu.VMEM((1, gC), jnp.float32)],
            compiler_params=pltpu.CompilerParams(
                dimension_semantics=("parallel", "arbitrary"),
                vmem_limit_bytes=vmem_limit),
        )(xp, w_bd, gbp, fold)

        out = pl.pallas_call(
            functools.partial(_apply_kernel, slope=float(leaky_slope)),
            out_shape=jax.ShapeDtypeStruct((N, Rp_pad, gC), out_dtype),
            grid=(N, n_tiles),
            in_specs=[
                pl.BlockSpec((None, tile_p, gKc), lambda n, t: (n, t, 0)),
                pl.BlockSpec((gKc, gC), lambda n, t: (0, 0)),
                pl.BlockSpec((None, 2, gC), lambda n, t: (n, 0, 0)),
            ],
            out_specs=pl.BlockSpec((None, tile_p, gC), lambda n, t: (n, t, 0)),
            compiler_params=pltpu.CompilerParams(
                dimension_semantics=("parallel", "parallel"),
                vmem_limit_bytes=vmem_limit),
        )(xp, w_bd, ss)

    if padded:
        out = out[:, :Rp, :]
    return out.reshape(N, Ho, Wo, Cout)


# ------------------------------ full encoder ---------------------------------

def encoder_ae(x_nchw, params, *, kernel_size=2, stride=2, leaky_slope=0.3,
               eps=1e-5, compute_dtype=jnp.bfloat16):
    """EncoderAE forward: chain of EncoderBlocks.  params = [(w, b, gamma, beta), ...]."""
    y = jnp.transpose(x_nchw, (0, 2, 3, 1))                    # NCHW -> NHWC once
    nl = len(params)
    for i, (w, b, gamma, beta) in enumerate(params):
        layer_out_dtype = compute_dtype if i + 1 < nl else jnp.float32
        y = encoder_block_pallas(y, w, b, gamma, beta,
                                 kernel_size=kernel_size, stride=stride,
                                 leaky_slope=leaky_slope, eps=eps,
                                 compute_dtype=compute_dtype,
                                 out_dtype=layer_out_dtype)
    return jnp.transpose(y, (0, 3, 1, 2))                      # NHWC -> NCHW


def encoder_ae_reference(x, params, *, stride=2, leaky_slope=0.3, eps=1e-5):
    """Pure-JAX reference: Conv2d(valid, stride) + InstanceNorm2d(affine) + LeakyReLU."""
    y = x
    for (w, b, gamma, beta) in params:
        y = jax.lax.conv_general_dilated(
            y, w, window_strides=(stride, stride), padding="VALID",
            dimension_numbers=("NCHW", "OIHW", "NCHW"),
            precision=jax.lax.Precision.HIGHEST)
        y = y + b[None, :, None, None]
        mean = y.mean(axis=(2, 3), keepdims=True)
        var = ((y - mean) ** 2).mean(axis=(2, 3), keepdims=True)
        y = (y - mean) * jax.lax.rsqrt(var + eps)
        y = y * gamma[None, :, None, None] + beta[None, :, None, None]
        y = jnp.where(y >= 0, y, leaky_slope * y)
    return y


# --------------------------------- main ---------------------------------------

if __name__ == "__main__":
    N, in_channels, H, W = 2, 3, 16, 16
    base_channels, num_layers = 8, 3
    K = S = 2
    leaky_slope = 0.3

    key = jax.random.PRNGKey(0)
    key, kx = jax.random.split(key)
    x = jax.random.normal(kx, (N, in_channels, H, W), dtype=jnp.float32)

    params = []
    cin = in_channels
    for i in range(num_layers):
        cout = base_channels * (2 ** i)
        key, kw, kb, kg, kbe = jax.random.split(key, 5)
        w = 0.3 * jax.random.normal(kw, (cout, cin, K, K), dtype=jnp.float32)
        b = 0.1 * jax.random.normal(kb, (cout,), dtype=jnp.float32)
        gamma = 1.0 + 0.1 * jax.random.normal(kg, (cout,), dtype=jnp.float32)
        beta = 0.1 * jax.random.normal(kbe, (cout,), dtype=jnp.float32)
        params.append((w, b, gamma, beta))
        cin = cout

    y_ref = encoder_ae_reference(x, params, stride=S, leaky_slope=leaky_slope)
    expect_shape = (N, base_channels * 2 ** (num_layers - 1),
                    H // (S ** num_layers), W // (S ** num_layers))

    # Exactness check: f32 compute path vs pure-JAX reference (tight tolerance).
    enc_f32 = jax.jit(lambda xx, pp: encoder_ae(
        xx, pp, kernel_size=K, stride=S, leaky_slope=leaky_slope,
        compute_dtype=jnp.float32))
    y32 = jax.block_until_ready(enc_f32(x, params))
    assert y32.shape == expect_shape, y32.shape
    err32 = float(jnp.max(jnp.abs(y32 - y_ref)))
    assert jnp.allclose(y32, y_ref, rtol=5e-4, atol=5e-4), err32

    # Perf path (v5e/v6e/v7x): bf16 MXU inputs + bf16 intermediate activations,
    # f32 stats/normalization.  Looser tolerance only reflects bf16 rounding
    # propagated through 3 normalized layers; the algorithm is validated exactly
    # by the f32 check above.
    enc_bf16 = jax.jit(lambda xx, pp: encoder_ae(
        xx, pp, kernel_size=K, stride=S, leaky_slope=leaky_slope,
        compute_dtype=jnp.bfloat16))
    ybf = jax.block_until_ready(enc_bf16(x, params))
    assert ybf.shape == expect_shape, ybf.shape
    errbf = float(jnp.max(jnp.abs(ybf - y_ref)))
    assert jnp.allclose(ybf, y_ref, rtol=1e-1, atol=1e-1), errbf

    print("KERNEL_OK")
</pallas_src>

<mosaic_0001>
module attributes {stable_mosaic.version = 11 : i64} {
  func.func @_fused_block_kernel(%arg0: i32, %arg1: i32, %arg2: i32, %arg3: memref<1x4x256xf32, #tpu.memory_space<vmem>>, %arg4: memref<256x128xf32, #tpu.memory_space<vmem>>, %arg5: memref<2x128xf32, #tpu.memory_space<vmem>>, %arg6: memref<128x128xf32, #tpu.memory_space<vmem>>, %arg7: memref<1x4x128xf32, #tpu.memory_space<vmem>>, %arg8: memref<1x4x128xf32, #tpu.memory_space<vmem>>, %arg9: memref<1x128xf32, #tpu.memory_space<vmem>>, %arg10: memref<1x128xf32, #tpu.memory_space<vmem>>, %arg11: memref<2x128xf32, #tpu.memory_space<vmem>>) attributes {dimension_semantics = [#tpu.dimension_semantics<parallel>, #tpu.dimension_semantics<arbitrary>, #tpu.dimension_semantics<arbitrary>], iteration_bounds = array<i64: 2, 2, 1>, scalar_prefetch = 0 : i64, scratch_operands = 4 : i64, tpu.core_type = #tpu.core_type<tc>, window_params = [{transform_indices = @transform_0, window_bounds = array<i64: 1, 4, 256>}, {pipeline_mode = #tpu.pipeline_mode<synchronous>, transform_indices = @transform_1, window_bounds = array<i64: 256, 128>}, {pipeline_mode = #tpu.pipeline_mode<synchronous>, transform_indices = @transform_2, window_bounds = array<i64: 2, 128>}, {pipeline_mode = #tpu.pipeline_mode<synchronous>, transform_indices = @transform_3, window_bounds = array<i64: 128, 128>}, {transform_indices = @transform_4, window_bounds = array<i64: 1, 4, 128>}]} {
    %c0_i32 = arith.constant 0 : i32
    %0 = arith.cmpi eq, %arg1, %c0_i32 : i32
    %1 = arith.extui %0 : i1 to i32
    %c0_i32_0 = arith.constant 0 : i32
    %2 = arith.cmpi ne, %1, %c0_i32_0 : i32
    scf.if %2 {
      %c0 = arith.constant 0 : index
      %c0_2 = arith.constant 0 : index
      %c0_3 = arith.constant 0 : index
      %6 = vector.load %arg3[%c0, %c0_2, %c0_3] : memref<1x4x256xf32, #tpu.memory_space<vmem>>, vector<1x4x256xf32>
      %7 = vector.shape_cast %6 : vector<1x4x256xf32> to vector<4x256xf32>
      %c0_4 = arith.constant 0 : index
      %c0_5 = arith.constant 0 : index
      %8 = vector.load %arg4[%c0_4, %c0_5] : memref<256x128xf32, #tpu.memory_space<vmem>>, vector<256x128xf32>
      %cst = arith.constant dense<0.000000e+00> : vector<4x128xf32>
      %9 = tpu.matmul %7, %8, %cst {dimension_numbers = #tpu.dot_dimension_numbers<[1], [0], [0], [1], [0, 0, 1, 1], [], []>} : vector<4x256xf32>, vector<256x128xf32>, vector<4x128xf32> -> vector<4x128xf32>
      %c0_6 = arith.constant 0 : index
      %c0_7 = arith.constant 0 : index
      %c0_8 = arith.constant 0 : index
      %10 = vector.load %arg8[%c0_6, %c0_7, %c0_8] : memref<1x4x128xf32, #tpu.memory_space<vmem>>, vector<1x4x128xf32>
      %11 = vector.shape_cast %10 : vector<1x4x128xf32> to vector<4x128xf32>
      %12 = vector.shape_cast %9 : vector<4x128xf32> to vector<1x4x128xf32>
      tpu.vector_store %arg8[%c0_6, %c0_7, %c0_8], %12 {strides = array<i32>} : memref<1x4x128xf32, #tpu.memory_space<vmem>>, vector<1x4x128xf32>,
      %cst_9 = arith.constant dense<0.000000e+00> : vector<128xf32>
      %13 = vector.multi_reduction <add>, %9, %cst_9 [0] : vector<4x128xf32> to vector<128xf32>
      %14 = vector.shape_cast %13 : vector<128xf32> to vector<1x128xf32>
      %cst_10 = arith.constant 4.000000e+00 : f32
      %15 = vector.broadcast %cst_10 : f32 to vector<1x128xf32>
      %16 = arith.divf %14, %15 : vector<1x128xf32>
      %17 = vector.broadcast %16 : vector<1x128xf32> to vector<4x128xf32>
      %18 = arith.subf %9, %17 : vector<4x128xf32>
      %19 = arith.mulf %18, %18 : vector<4x128xf32>
      %cst_11 = arith.constant dense<0.000000e+00> : vector<128xf32>
      %20 = vector.multi_reduction <add>, %19, %cst_11 [0] : vector<4x128xf32> to vector<128xf32>
      %21 = vector.shape_cast %20 : vector<128xf32> to vector<1x128xf32>
      %c0_i32_12 = arith.constant 0 : i32
      %22 = arith.cmpi eq, %arg2, %c0_i32_12 : i32
      %23 = arith.extui %22 : i1 to i32
      %c0_i32_13 = arith.constant 0 : i32
      %24 = arith.cmpi ne, %23, %c0_i32_13 : i32
      scf.if %24 {
        %c0_19 = arith.constant 0 : index
        %c0_20 = arith.constant 0 : index
        %31 = vector.load %arg9[%c0_19, %c0_20] : memref<1x128xf32, #tpu.memory_space<vmem>>, vector<1x128xf32>
        tpu.vector_store %arg9[%c0_19, %c0_20], %16 {strides = array<i32>} : memref<1x128xf32, #tpu.memory_space<vmem>>, vector<1x128xf32>,
        %c0_21 = arith.constant 0 : index
        %c0_22 = arith.constant 0 : index
        %32 = vector.load %arg10[%c0_21, %c0_22] : memref<1x128xf32, #tpu.memory_space<vmem>>, vector<1x128xf32>
        tpu.vector_store %arg10[%c0_21, %c0_22], %21 {strides = array<i32>} : memref<1x128xf32, #tpu.memory_space<vmem>>, vector<1x128xf32>,
      } else {
      }
      %c0_i32_14 = arith.constant 0 : i32
      %25 = arith.cmpi sgt, %arg2, %c0_i32_14 : i32
      %26 = arith.extui %25 : i1 to i32
      %cst_15 = arith.constant 4.000000e+00 : f32
      %c0_i32_16 = arith.constant 0 : i32
      %27 = arith.cmpi ne, %26, %c0_i32_16 : i32
      scf.if %27 {
        %c4_i32 = arith.constant 4 : i32
        %31 = arith.muli %arg2, %c4_i32 : i32
        %32 = arith.sitofp %31 : i32 to f32
        %33 = arith.addf %32, %cst_15 : f32
        %c0_19 = arith.constant 0 : index
        %c0_20 = arith.constant 0 : index
        %34 = vector.load %arg9[%c0_19, %c0_20] : memref<1x128xf32, #tpu.memory_space<vmem>>, vector<1x128xf32>
        %35 = arith.subf %16, %34 : vector<1x128xf32>
        %c0_21 = arith.constant 0 : index
        %c0_22 = arith.constant 0 : index
        %36 = vector.load %arg9[%c0_21, %c0_22] : memref<1x128xf32, #tpu.memory_space<vmem>>, vector<1x128xf32>
        %37 = arith.divf %cst_15, %33 : f32
        %38 = vector.broadcast %37 : f32 to vector<1x128xf32>
        %39 = arith.mulf %35, %38 : vector<1x128xf32>
        %40 = arith.addf %36, %39 : vector<1x128xf32>
        %c0_23 = arith.constant 0 : index
        %c0_24 = arith.constant 0 : index
        %41 = vector.load %arg9[%c0_23, %c0_24] : memref<1x128xf32, #tpu.memory_space<vmem>>, vector<1x128xf32>
        tpu.vector_store %arg9[%c0_23, %c0_24], %40 {strides = array<i32>} : memref<1x128xf32, #tpu.memory_space<vmem>>, vector<1x128xf32>,
        %c0_25 = arith.constant 0 : index
        %c0_26 = arith.constant 0 : index
        %42 = vector.load %arg10[%c0_25, %c0_26] : memref<1x128xf32, #tpu.memory_space<vmem>>, vector<1x128xf32>
        %43 = arith.addf %42, %21 : vector<1x128xf32>
        %44 = arith.mulf %35, %35 : vector<1x128xf32>
        %45 = arith.mulf %32, %cst_15 : f32
        %46 = arith.divf %45, %33 : f32
        %47 = vector.broadcast %46 : f32 to vector<1x128xf32>
        %48 = arith.mulf %44, %47 : vector<1x128xf32>
        %49 = arith.addf %43, %48 : vector<1x128xf32>
        %c0_27 = arith.constant 0 : index
        %c0_28 = arith.constant 0 : index
        %50 = vector.load %arg10[%c0_27, %c0_28] : memref<1x128xf32, #tpu.memory_space<vmem>>, vector<1x128xf32>
        tpu.vector_store %arg10[%c0_27, %c0_28], %49 {strides = array<i32>} : memref<1x128xf32, #tpu.memory_space<vmem>>, vector<1x128xf32>,
      } else {
      }
      %c0_i32_17 = arith.constant 0 : i32
      %28 = arith.cmpi eq, %arg2, %c0_i32_17 : i32
      %29 = arith.extui %28 : i1 to i32
      %c0_i32_18 = arith.constant 0 : i32
      %30 = arith.cmpi ne, %29, %c0_i32_18 : i32
      scf.if %30 {
        %c0_19 = arith.constant 0 : index
        %c0_20 = arith.constant 0 : index
        %31 = vector.load %arg9[%c0_19, %c0_20] : memref<1x128xf32, #tpu.memory_space<vmem>>, vector<1x128xf32>
        %c0_21 = arith.constant 0 : index
        %c0_22 = arith.constant 0 : index
        %32 = vector.load %arg10[%c0_21, %c0_22] : memref<1x128xf32, #tpu.memory_space<vmem>>, vector<1x128xf32>
        %c0_23 = arith.constant 0 : index
        %c0_24 = arith.constant 0 : index
        %33 = vector.load %arg5[%c0_23, %c0_24] : memref<2x128xf32, #tpu.memory_space<vmem>>, vector<2x128xf32>
        %c0_25 = arith.constant 0 : index
        %c0_26 = arith.constant 0 : index
        %34 = vector.load %arg6[%c0_25, %c0_26] : memref<128x128xf32, #tpu.memory_space<vmem>>, vector<128x128xf32>
        %cst_27 = arith.constant dense<0.000000e+00> : vector<1x128xf32>
        %35 = tpu.matmul %31, %34, %cst_27 {dimension_numbers = #tpu.dot_dimension_numbers<[1], [0], [0], [1], [0, 0, 1, 1], [], []>} : vector<1x128xf32>, vector<128x128xf32>, vector<1x128xf32> -> vector<1x128xf32>
        %cst_28 = arith.constant 1.600000e+01 : f32
        %36 = vector.broadcast %cst_28 : f32 to vector<1x128xf32>
        %37 = arith.divf %35, %36 : vector<1x128xf32>
        %cst_29 = arith.constant dense<0.000000e+00> : vector<1x128xf32>
        %38 = tpu.matmul %32, %34, %cst_29 {dimension_numbers = #tpu.dot_dimension_numbers<[1], [0], [0], [1], [0, 0, 1, 1], [], []>} : vector<1x128xf32>, vector<128x128xf32>, vector<1x128xf32> -> vector<1x128xf32>
        %39 = arith.subf %31, %37 : vector<1x128xf32>
        %40 = arith.mulf %39, %39 : vector<1x128xf32>
        %cst_30 = arith.constant dense<0.000000e+00> : vector<1x128xf32>
        %41 = tpu.matmul %40, %34, %cst_30 {dimension_numbers = #tpu.dot_dimension_numbers<[1], [0], [0], [1], [0, 0, 1, 1], [], []>} : vector<1x128xf32>, vector<128x128xf32>, vector<1x128xf32> -> vector<1x128xf32>
        %cst_31 = arith.constant 4.000000e+00 : f32
        %42 = vector.broadcast %cst_31 : f32 to vector<1x128xf32>
        %43 = arith.mulf %42, %41 : vector<1x128xf32>
        %44 = arith.addf %38, %43 : vector<1x128xf32>
        %cst_32 = arith.constant 6.400000e+01 : f32
        %45 = vector.broadcast %cst_32 : f32 to vector<1x128xf32>
        %46 = arith.divf %44, %45 : vector<1x128xf32>
        %cst_33 = arith.constant 9.99999974E-6 : f32
        %47 = vector.broadcast %cst_33 : f32 to vector<1x128xf32>
        %48 = arith.addf %46, %47 : vector<1x128xf32>
        %49 = math.rsqrt %48 : vector<1x128xf32>
        %50 = vector.extract_strided_slice %33 {offsets = [0, 0], sizes = [1, 128], strides = [1, 1]} : vector<2x128xf32> to vector<1x128xf32>
        %51 = arith.mulf %50, %49 : vector<1x128xf32>
        %52 = vector.extract_strided_slice %33 {offsets = [1, 0], sizes = [1, 128], strides = [1, 1]} : vector<2x128xf32> to vector<1x128xf32>
        %53 = arith.mulf %37, %51 : vector<1x128xf32>
        %54 = arith.subf %52, %53 : vector<1x128xf32>
        %c0_34 = arith.constant 0 : index
        %c0_35 = arith.constant 0 : index
        %55 = vector.load %arg11[%c0_34, %c0_35] : memref<2x128xf32, #tpu.memory_space<vmem>>, vector<1x128xf32>
        tpu.vector_store %arg11[%c0_34, %c0_35], %51 {strides = array<i32>} : memref<2x128xf32, #tpu.memory_space<vmem>>, vector<1x128xf32>,
        %c1 = arith.constant 1 : index
        %c0_36 = arith.constant 0 : index
        %56 = vector.load %arg11[%c1, %c0_36] : memref<2x128xf32, #tpu.memory_space<vmem>>, vector<1x128xf32>
        tpu.vector_store %arg11[%c1, %c0_36], %54 {strides = array<i32>} : memref<2x128xf32, #tpu.memory_space<vmem>>, vector<1x128xf32>,
      } else {
      }
    } else {
    }
    %c1_i32 = arith.constant 1 : i32
    %3 = arith.cmpi eq, %arg1, %c1_i32 : i32
    %4 = arith.extui %3 : i1 to i32
    %c0_i32_1 = arith.constant 0 : i32
    %5 = arith.cmpi ne, %4, %c0_i32_1 : i32
    scf.if %5 {
      %c0 = arith.constant 0 : index
      %c0_2 = arith.constant 0 : index
      %c0_3 = arith.constant 0 : index
      %6 = vector.load %arg8[%c0, %c0_2, %c0_3] : memref<1x4x128xf32, #tpu.memory_space<vmem>>, vector<1x4x128xf32>
      %7 = vector.shape_cast %6 : vector<1x4x128xf32> to vector<4x128xf32>
      %c0_4 = arith.constant 0 : index
      %c0_5 = arith.constant 0 : index
      %8 = vector.load %arg11[%c0_4, %c0_5] : memref<2x128xf32, #tpu.memory_space<vmem>>, vector<1x128xf32>
      %9 = vector.broadcast %8 : vector<1x128xf32> to vector<4x128xf32>
      %10 = arith.mulf %7, %9 : vector<4x128xf32>
      %c1 = arith.constant 1 : index
      %c0_6 = arith.constant 0 : index
      %11 = vector.load %arg11[%c1, %c0_6] : memref<2x128xf32, #tpu.memory_space<vmem>>, vector<1x128xf32>
      %12 = vector.broadcast %11 : vector<1x128xf32> to vector<4x128xf32>
      %13 = arith.addf %10, %12 : vector<4x128xf32>
      %cst = arith.constant 0.000000e+00 : f32
      %14 = vector.broadcast %cst : f32 to vector<4x128xf32>
      %15 = arith.cmpf oge, %13, %14 : vector<4x128xf32>
      %cst_7 = arith.constant 3.000000e-01 : f32
      %16 = vector.broadcast %cst_7 : f32 to vector<4x128xf32>
      %17 = arith.mulf %13, %16 : vector<4x128xf32>
      %18 = arith.select %15, %13, %17 : vector<4x128xi1>, vector<4x128xf32>
      %c0_8 = arith.constant 0 : index
      %c0_9 = arith.constant 0 : index
      %c0_10 = arith.constant 0 : index
      %19 = vector.load %arg7[%c0_8, %c0_9, %c0_10] : memref<1x4x128xf32, #tpu.memory_space<vmem>>, vector<1x4x128xf32>
      %20 = vector.shape_cast %19 : vector<1x4x128xf32> to vector<4x128xf32>
      %21 = vector.shape_cast %18 : vector<4x128xf32> to vector<1x4x128xf32>
      tpu.vector_store %arg7[%c0_8, %c0_9, %c0_10], %21 {strides = array<i32>} : memref<1x4x128xf32, #tpu.memory_space<vmem>>, vector<1x4x128xf32>,
    } else {
    }
    return
  }
  func.func @transform_0(%arg0: i32, %arg1: i32, %arg2: i32) -> (i32, i32, i32) {
    %c1_i32 = arith.constant 1 : i32
    %0 = arith.subi %c1_i32, %arg1 : i32
    %1 = arith.muli %arg2, %0 : i32
    %c0_i32 = arith.constant 0 : i32
    %2 = arith.muli %c0_i32, %arg1 : i32
    %3 = arith.addi %1, %2 : i32
    %c0_i32_0 = arith.constant 0 : i32
    %c0_i32_1 = arith.constant 0 : i32
    return %arg0, %3, %c0_i32_0 : i32, i32, i32
  }
  func.func @transform_1(%arg0: i32, %arg1: i32, %arg2: i32) -> (i32, i32) {
    %c0_i32 = arith.constant 0 : i32
    %c0_i32_0 = arith.constant 0 : i32
    %c0_i32_1 = arith.constant 0 : i32
    return %c0_i32, %c0_i32_0 : i32, i32
  }
  func.func @transform_2(%arg0: i32, %arg1: i32, %arg2: i32) -> (i32, i32) {
    %c0_i32 = arith.constant 0 : i32
    %c0_i32_0 = arith.constant 0 : i32
    %c0_i32_1 = arith.constant 0 : i32
    return %c0_i32, %c0_i32_0 : i32, i32
  }
  func.func @transform_3(%arg0: i32, %arg1: i32, %arg2: i32) -> (i32, i32) {
    %c0_i32 = arith.constant 0 : i32
    %c0_i32_0 = arith.constant 0 : i32
    %c0_i32_1 = arith.constant 0 : i32
    return %c0_i32, %c0_i32_0 : i32, i32
  }
  func.func @transform_4(%arg0: i32, %arg1: i32, %arg2: i32) -> (i32, i32, i32) {
    %0 = arith.muli %arg2, %arg1 : i32
    %c0_i32 = arith.constant 0 : i32
    %c0_i32_0 = arith.constant 0 : i32
    return %arg0, %0, %c0_i32 : i32, i32, i32
  }
}

module attributes {stable_mosaic.version = 11 : i64} {
  func.func @_fused_block_kernel(%arg0: i32, %arg1: i32, %arg2: i32, %arg3: memref<1x2x256xf32, #tpu.memory_space<vmem>>, %arg4: memref<256x128xf32, #tpu.memory_space<vmem>>, %arg5: memref<2x128xf32, #tpu.memory_space<vmem>>, %arg6: memref<128x128xf32, #tpu.memory_space<vmem>>, %arg7: memref<1x2x128xf32, #tpu.memory_space<vmem>>, %arg8: memref<1x2x128xf32, #tpu.memory_space<vmem>>, %arg9: memref<1x128xf32, #tpu.memory_space<vmem>>, %arg10: memref<1x128xf32, #tpu.memory_space<vmem>>, %arg11: memref<2x128xf32, #tpu.memory_space<vmem>>) attributes {dimension_semantics = [#tpu.dimension_semantics<parallel>, #tpu.dimension_semantics<arbitrary>, #tpu.dimension_semantics<arbitrary>], iteration_bounds = array<i64: 2, 2, 1>, scalar_prefetch = 0 : i64, scratch_operands = 4 : i64, tpu.core_type = #tpu.core_type<tc>, window_params = [{transform_indices = @transform_0, window_bounds = array<i64: 1, 2, 256>}, {pipeline_mode = #tpu.pipeline_mode<synchronous>, transform_indices = @transform_1, window_bounds = array<i64: 256, 128>}, {pipeline_mode = #tpu.pipeline_mode<synchronous>, transform_indices = @transform_2, window_bounds = array<i64: 2, 128>}, {pipeline_mode = #tpu.pipeline_mode<synchronous>, transform_indices = @transform_3, window_bounds = array<i64: 128, 128>}, {transform_indices = @transform_4, window_bounds = array<i64: 1, 2, 128>}]} {
    %c0_i32 = arith.constant 0 : i32
    %0 = arith.cmpi eq, %arg1, %c0_i32 : i32
    %1 = arith.extui %0 : i1 to i32
    %c0_i32_0 = arith.constant 0 : i32
    %2 = arith.cmpi ne, %1, %c0_i32_0 : i32
    scf.if %2 {
      %c0 = arith.constant 0 : index
      %c0_2 = arith.constant 0 : index
      %c0_3 = arith.constant 0 : index
      %6 = vector.load %arg3[%c0, %c0_2, %c0_3] : memref<1x2x256xf32, #tpu.memory_space<vmem>>, vector<1x2x256xf32>
      %7 = vector.shape_cast %6 : vector<1x2x256xf32> to vector<2x256xf32>
      %c0_4 = arith.constant 0 : index
      %c0_5 = arith.constant 0 : index
      %8 = vector.load %arg4[%c0_4, %c0_5] : memref<256x128xf32, #tpu.memory_space<vmem>>, vector<256x128xf32>
      %cst = arith.constant dense<0.000000e+00> : vector<2x128xf32>
      %9 = tpu.matmul %7, %8, %cst {dimension_numbers = #tpu.dot_dimension_numbers<[1], [0], [0], [1], [0, 0, 1, 1], [], []>} : vector<2x256xf32>, vector<256x128xf32>, vector<2x128xf32> -> vector<2x128xf32>
      %c0_6 = arith.constant 0 : index
      %c0_7 = arith.constant 0 : index
      %c0_8 = arith.constant 0 : index
      %10 = vector.load %arg8[%c0_6, %c0_7, %c0_8] : memref<1x2x128xf32, #tpu.memory_space<vmem>>, vector<1x2x128xf32>
      %11 = vector.shape_cast %10 : vector<1x2x128xf32> to vector<2x128xf32>
      %12 = vector.shape_cast %9 : vector<2x128xf32> to vector<1x2x128xf32>
      tpu.vector_store %arg8[%c0_6, %c0_7, %c0_8], %12 {strides = array<i32>} : memref<1x2x128xf32, #tpu.memory_space<vmem>>, vector<1x2x128xf32>,
      %cst_9 = arith.constant dense<0.000000e+00> : vector<128xf32>
      %13 = vector.multi_reduction <add>, %9, %cst_9 [0] : vector<2x128xf32> to vector<128xf32>
      %14 = vector.shape_cast %13 : vector<128xf32> to vector<1x128xf32>
      %cst_10 = arith.constant 2.000000e+00 : f32
      %15 = vector.broadcast %cst_10 : f32 to vector<1x128xf32>
      %16 = arith.divf %14, %15 : vector<1x128xf32>
      %17 = vector.broadcast %16 : vector<1x128xf32> to vector<2x128xf32>
      %18 = arith.subf %9, %17 : vector<2x128xf32>
      %19 = arith.mulf %18, %18 : vector<2x128xf32>
      %cst_11 = arith.constant dense<0.000000e+00> : vector<128xf32>
      %20 = vector.multi_reduction <add>, %19, %cst_11 [0] : vector<2x128xf32> to vector<128xf32>
      %21 = vector.shape_cast %20 : vector<128xf32> to vector<1x128xf32>
      %c0_i32_12 = arith.constant 0 : i32
      %22 = arith.cmpi eq, %arg2, %c0_i32_12 : i32
      %23 = arith.extui %22 : i1 to i32
      %c0_i32_13 = arith.constant 0 : i32
      %24 = arith.cmpi ne, %23, %c0_i32_13 : i32
      scf.if %24 {
        %c0_19 = arith.constant 0 : index
        %c0_20 = arith.constant 0 : index
        %31 = vector.load %arg9[%c0_19, %c0_20] : memref<1x128xf32, #tpu.memory_space<vmem>>, vector<1x128xf32>
        tpu.vector_store %arg9[%c0_19, %c0_20], %16 {strides = array<i32>} : memref<1x128xf32, #tpu.memory_space<vmem>>, vector<1x128xf32>,
        %c0_21 = arith.constant 0 : index
        %c0_22 = arith.constant 0 : index
        %32 = vector.load %arg10[%c0_21, %c0_22] : memref<1x128xf32, #tpu.memory_space<vmem>>, vector<1x128xf32>
        tpu.vector_store %arg10[%c0_21, %c0_22], %21 {strides = array<i32>} : memref<1x128xf32, #tpu.memory_space<vmem>>, vector<1x128xf32>,
      } else {
      }
      %c0_i32_14 = arith.constant 0 : i32
      %25 = arith.cmpi sgt, %arg2, %c0_i32_14 : i32
      %26 = arith.extui %25 : i1 to i32
      %cst_15 = arith.constant 2.000000e+00 : f32
      %c0_i32_16 = arith.constant 0 : i32
      %27 = arith.cmpi ne, %26, %c0_i32_16 : i32
      scf.if %27 {
        %c2_i32 = arith.constant 2 : i32
        %31 = arith.muli %arg2, %c2_i32 : i32
        %32 = arith.sitofp %31 : i32 to f32
        %33 = arith.addf %32, %cst_15 : f32
        %c0_19 = arith.constant 0 : index
        %c0_20 = arith.constant 0 : index
        %34 = vector.load %arg9[%c0_19, %c0_20] : memref<1x128xf32, #tpu.memory_space<vmem>>, vector<1x128xf32>
        %35 = arith.subf %16, %34 : vector<1x128xf32>
        %c0_21 = arith.constant 0 : index
        %c0_22 = arith.constant 0 : index
        %36 = vector.load %arg9[%c0_21, %c0_22] : memref<1x128xf32, #tpu.memory_space<vmem>>, vector<1x128xf32>
        %37 = arith.divf %cst_15, %33 : f32
        %38 = vector.broadcast %37 : f32 to vector<1x128xf32>
        %39 = arith.mulf %35, %38 : vector<1x128xf32>
        %40 = arith.addf %36, %39 : vector<1x128xf32>
        %c0_23 = arith.constant 0 : index
        %c0_24 = arith.constant 0 : index
        %41 = vector.load %arg9[%c0_23, %c0_24] : memref<1x128xf32, #tpu.memory_space<vmem>>, vector<1x128xf32>
        tpu.vector_store %arg9[%c0_23, %c0_24], %40 {strides = array<i32>} : memref<1x128xf32, #tpu.memory_space<vmem>>, vector<1x128xf32>,
        %c0_25 = arith.constant 0 : index
        %c0_26 = arith.constant 0 : index
        %42 = vector.load %arg10[%c0_25, %c0_26] : memref<1x128xf32, #tpu.memory_space<vmem>>, vector<1x128xf32>
        %43 = arith.addf %42, %21 : vector<1x128xf32>
        %44 = arith.mulf %35, %35 : vector<1x128xf32>
        %45 = arith.mulf %32, %cst_15 : f32
        %46 = arith.divf %45, %33 : f32
        %47 = vector.broadcast %46 : f32 to vector<1x128xf32>
        %48 = arith.mulf %44, %47 : vector<1x128xf32>
        %49 = arith.addf %43, %48 : vector<1x128xf32>
        %c0_27 = arith.constant 0 : index
        %c0_28 = arith.constant 0 : index
        %50 = vector.load %arg10[%c0_27, %c0_28] : memref<1x128xf32, #tpu.memory_space<vmem>>, vector<1x128xf32>
        tpu.vector_store %arg10[%c0_27, %c0_28], %49 {strides = array<i32>} : memref<1x128xf32, #tpu.memory_space<vmem>>, vector<1x128xf32>,
      } else {
      }
      %c0_i32_17 = arith.constant 0 : i32
      %28 = arith.cmpi eq, %arg2, %c0_i32_17 : i32
      %29 = arith.extui %28 : i1 to i32
      %c0_i32_18 = arith.constant 0 : i32
      %30 = arith.cmpi ne, %29, %c0_i32_18 : i32
      scf.if %30 {
        %c0_19 = arith.constant 0 : index
        %c0_20 = arith.constant 0 : index
        %31 = vector.load %arg9[%c0_19, %c0_20] : memref<1x128xf32, #tpu.memory_space<vmem>>, vector<1x128xf32>
        %c0_21 = arith.constant 0 : index
        %c0_22 = arith.constant 0 : index
        %32 = vector.load %arg10[%c0_21, %c0_22] : memref<1x128xf32, #tpu.memory_space<vmem>>, vector<1x128xf32>
        %c0_23 = arith.constant 0 : index
        %c0_24 = arith.constant 0 : index
        %33 = vector.load %arg5[%c0_23, %c0_24] : memref<2x128xf32, #tpu.memory_space<vmem>>, vector<2x128xf32>
        %c0_25 = arith.constant 0 : index
        %c0_26 = arith.constant 0 : index
        %34 = vector.load %arg6[%c0_25, %c0_26] : memref<128x128xf32, #tpu.memory_space<vmem>>, vector<128x128xf32>
        %cst_27 = arith.constant dense<0.000000e+00> : vector<1x128xf32>
        %35 = tpu.matmul %31, %34, %cst_27 {dimension_numbers = #tpu.dot_dimension_numbers<[1], [0], [0], [1], [0, 0, 1, 1], [], []>} : vector<1x128xf32>, vector<128x128xf32>, vector<1x128xf32> -> vector<1x128xf32>
        %cst_28 = arith.constant 8.000000e+00 : f32
        %36 = vector.broadcast %cst_28 : f32 to vector<1x128xf32>
        %37 = arith.divf %35, %36 : vector<1x128xf32>
        %cst_29 = arith.constant dense<0.000000e+00> : vector<1x128xf32>
        %38 = tpu.matmul %32, %34, %cst_29 {dimension_numbers = #tpu.dot_dimension_numbers<[1], [0], [0], [1], [0, 0, 1, 1], [], []>} : vector<1x128xf32>, vector<128x128xf32>, vector<1x128xf32> -> vector<1x128xf32>
        %39 = arith.subf %31, %37 : vector<1x128xf32>
        %40 = arith.mulf %39, %39 : vector<1x128xf32>
        %cst_30 = arith.constant dense<0.000000e+00> : vector<1x128xf32>
        %41 = tpu.matmul %40, %34, %cst_30 {dimension_numbers = #tpu.dot_dimension_numbers<[1], [0], [0], [1], [0, 0, 1, 1], [], []>} : vector<1x128xf32>, vector<128x128xf32>, vector<1x128xf32> -> vector<1x128xf32>
        %cst_31 = arith.constant 2.000000e+00 : f32
        %42 = vector.broadcast %cst_31 : f32 to vector<1x128xf32>
        %43 = arith.mulf %42, %41 : vector<1x128xf32>
        %44 = arith.addf %38, %43 : vector<1x128xf32>
        %cst_32 = arith.constant 1.600000e+01 : f32
        %45 = vector.broadcast %cst_32 : f32 to vector<1x128xf32>
        %46 = arith.divf %44, %45 : vector<1x128xf32>
        %cst_33 = arith.constant 9.99999974E-6 : f32
        %47 = vector.broadcast %cst_33 : f32 to vector<1x128xf32>
        %48 = arith.addf %46, %47 : vector<1x128xf32>
        %49 = math.rsqrt %48 : vector<1x128xf32>
        %50 = vector.extract_strided_slice %33 {offsets = [0, 0], sizes = [1, 128], strides = [1, 1]} : vector<2x128xf32> to vector<1x128xf32>
        %51 = arith.mulf %50, %49 : vector<1x128xf32>
        %52 = vector.extract_strided_slice %33 {offsets = [1, 0], sizes = [1, 128], strides = [1, 1]} : vector<2x128xf32> to vector<1x128xf32>
        %53 = arith.mulf %37, %51 : vector<1x128xf32>
        %54 = arith.subf %52, %53 : vector<1x128xf32>
        %c0_34 = arith.constant 0 : index
        %c0_35 = arith.constant 0 : index
        %55 = vector.load %arg11[%c0_34, %c0_35] : memref<2x128xf32, #tpu.memory_space<vmem>>, vector<1x128xf32>
        tpu.vector_store %arg11[%c0_34, %c0_35], %51 {strides = array<i32>} : memref<2x128xf32, #tpu.memory_space<vmem>>, vector<1x128xf32>,
        %c1 = arith.constant 1 : index
        %c0_36 = arith.constant 0 : index
        %56 = vector.load %arg11[%c1, %c0_36] : memref<2x128xf32, #tpu.memory_space<vmem>>, vector<1x128xf32>
        tpu.vector_store %arg11[%c1, %c0_36], %54 {strides = array<i32>} : memref<2x128xf32, #tpu.memory_space<vmem>>, vector<1x128xf32>,
      } else {
      }
    } else {
    }
    %c1_i32 = arith.constant 1 : i32
    %3 = arith.cmpi eq, %arg1, %c1_i32 : i32
    %4 = arith.extui %3 : i1 to i32
    %c0_i32_1 = arith.constant 0 : i32
    %5 = arith.cmpi ne, %4, %c0_i32_1 : i32
    scf.if %5 {
      %c0 = arith.constant 0 : index
      %c0_2 = arith.constant 0 : index
      %c0_3 = arith.constant 0 : index
      %6 = vector.load %arg8[%c0, %c0_2, %c0_3] : memref<1x2x128xf32, #tpu.memory_space<vmem>>, vector<1x2x128xf32>
      %7 = vector.shape_cast %6 : vector<1x2x128xf32> to vector<2x128xf32>
      %c0_4 = arith.constant 0 : index
      %c0_5 = arith.constant 0 : index
      %8 = vector.load %arg11[%c0_4, %c0_5] : memref<2x128xf32, #tpu.memory_space<vmem>>, vector<1x128xf32>
      %9 = vector.broadcast %8 : vector<1x128xf32> to vector<2x128xf32>
      %10 = arith.mulf %7, %9 : vector<2x128xf32>
      %c1 = arith.constant 1 : index
      %c0_6 = arith.constant 0 : index
      %11 = vector.load %arg11[%c1, %c0_6] : memref<2x128xf32, #tpu.memory_space<vmem>>, vector<1x128xf32>
      %12 = vector.broadcast %11 : vector<1x128xf32> to vector<2x128xf32>
      %13 = arith.addf %10, %12 : vector<2x128xf32>
      %cst = arith.constant 0.000000e+00 : f32
      %14 = vector.broadcast %cst : f32 to vector<2x128xf32>
      %15 = arith.cmpf oge, %13, %14 : vector<2x128xf32>
      %cst_7 = arith.constant 3.000000e-01 : f32
      %16 = vector.broadcast %cst_7 : f32 to vector<2x128xf32>
      %17 = arith.mulf %13, %16 : vector<2x128xf32>
      %18 = arith.select %15, %13, %17 : vector<2x128xi1>, vector<2x128xf32>
      %c0_8 = arith.constant 0 : index
      %c0_9 = arith.constant 0 : index
      %c0_10 = arith.constant 0 : index
      %19 = vector.load %arg7[%c0_8, %c0_9, %c0_10] : memref<1x2x128xf32, #tpu.memory_space<vmem>>, vector<1x2x128xf32>
      %20 = vector.shape_cast %19 : vector<1x2x128xf32> to vector<2x128xf32>
      %21 = vector.shape_cast %18 : vector<2x128xf32> to vector<1x2x128xf32>
      tpu.vector_store %arg7[%c0_8, %c0_9, %c0_10], %21 {strides = array<i32>} : memref<1x2x128xf32, #tpu.memory_space<vmem>>, vector<1x2x128xf32>,
    } else {
    }
    return
  }
  func.func @transform_0(%arg0: i32, %arg1: i32, %arg2: i32) -> (i32, i32, i32) {
    %c1_i32 = arith.constant 1 : i32
    %0 = arith.subi %c1_i32, %arg1 : i32
    %1 = arith.muli %arg2, %0 : i32
    %c0_i32 = arith.constant 0 : i32
    %2 = arith.muli %c0_i32, %arg1 : i32
    %3 = arith.addi %1, %2 : i32
    %c0_i32_0 = arith.constant 0 : i32
    %c0_i32_1 = arith.constant 0 : i32
    return %arg0, %3, %c0_i32_0 : i32, i32, i32
  }
  func.func @transform_1(%arg0: i32, %arg1: i32, %arg2: i32) -> (i32, i32) {
    %c0_i32 = arith.constant 0 : i32
    %c0_i32_0 = arith.constant 0 : i32
    %c0_i32_1 = arith.constant 0 : i32
    return %c0_i32, %c0_i32_0 : i32, i32
  }
  func.func @transform_2(%arg0: i32, %arg1: i32, %arg2: i32) -> (i32, i32) {
    %c0_i32 = arith.constant 0 : i32
    %c0_i32_0 = arith.constant 0 : i32
    %c0_i32_1 = arith.constant 0 : i32
    return %c0_i32, %c0_i32_0 : i32, i32
  }
  func.func @transform_3(%arg0: i32, %arg1: i32, %arg2: i32) -> (i32, i32) {
    %c0_i32 = arith.constant 0 : i32
    %c0_i32_0 = arith.constant 0 : i32
    %c0_i32_1 = arith.constant 0 : i32
    return %c0_i32, %c0_i32_0 : i32, i32
  }
  func.func @transform_4(%arg0: i32, %arg1: i32, %arg2: i32) -> (i32, i32, i32) {
    %0 = arith.muli %arg2, %arg1 : i32
    %c0_i32 = arith.constant 0 : i32
    %c0_i32_0 = arith.constant 0 : i32
    return %arg0, %0, %c0_i32 : i32, i32, i32
  }
}

module attributes {stable_mosaic.version = 11 : i64} {
  func.func @_fused_block_kernel(%arg0: i32, %arg1: i32, %arg2: i32, %arg3: memref<1x1x256xf32, #tpu.memory_space<vmem>>, %arg4: memref<256x128xf32, #tpu.memory_space<vmem>>, %arg5: memref<2x128xf32, #tpu.memory_space<vmem>>, %arg6: memref<128x128xf32, #tpu.memory_space<vmem>>, %arg7: memref<1x1x128xf32, #tpu.memory_space<vmem>>, %arg8: memref<1x1x128xf32, #tpu.memory_space<vmem>>, %arg9: memref<1x128xf32, #tpu.memory_space<vmem>>, %arg10: memref<1x128xf32, #tpu.memory_space<vmem>>, %arg11: memref<2x128xf32, #tpu.memory_space<vmem>>) attributes {dimension_semantics = [#tpu.dimension_semantics<parallel>, #tpu.dimension_semantics<arbitrary>, #tpu.dimension_semantics<arbitrary>], iteration_bounds = array<i64: 2, 2, 1>, scalar_prefetch = 0 : i64, scratch_operands = 4 : i64, tpu.core_type = #tpu.core_type<tc>, window_params = [{transform_indices = @transform_0, window_bounds = array<i64: 1, 1, 256>}, {pipeline_mode = #tpu.pipeline_mode<synchronous>, transform_indices = @transform_1, window_bounds = array<i64: 256, 128>}, {pipeline_mode = #tpu.pipeline_mode<synchronous>, transform_indices = @transform_2, window_bounds = array<i64: 2, 128>}, {pipeline_mode = #tpu.pipeline_mode<synchronous>, transform_indices = @transform_3, window_bounds = array<i64: 128, 128>}, {transform_indices = @transform_4, window_bounds = array<i64: 1, 1, 128>}]} {
    %c0_i32 = arith.constant 0 : i32
    %0 = arith.cmpi eq, %arg1, %c0_i32 : i32
    %1 = arith.extui %0 : i1 to i32
    %c0_i32_0 = arith.constant 0 : i32
    %2 = arith.cmpi ne, %1, %c0_i32_0 : i32
    scf.if %2 {
      %c0 = arith.constant 0 : index
      %c0_2 = arith.constant 0 : index
      %c0_3 = arith.constant 0 : index
      %6 = vector.load %arg3[%c0, %c0_2, %c0_3] : memref<1x1x256xf32, #tpu.memory_space<vmem>>, vector<1x1x256xf32>
      %7 = vector.shape_cast %6 : vector<1x1x256xf32> to vector<1x256xf32>
      %c0_4 = arith.constant 0 : index
      %c0_5 = arith.constant 0 : index
      %8 = vector.load %arg4[%c0_4, %c0_5] : memref<256x128xf32, #tpu.memory_space<vmem>>, vector<256x128xf32>
      %cst = arith.constant dense<0.000000e+00> : vector<1x128xf32>
      %9 = tpu.matmul %7, %8, %cst {dimension_numbers = #tpu.dot_dimension_numbers<[1], [0], [0], [1], [0, 0, 1, 1], [], []>} : vector<1x256xf32>, vector<256x128xf32>, vector<1x128xf32> -> vector<1x128xf32>
      %c0_6 = arith.constant 0 : index
      %c0_7 = arith.constant 0 : index
      %c0_8 = arith.constant 0 : index
      %10 = vector.load %arg8[%c0_6, %c0_7, %c0_8] : memref<1x1x128xf32, #tpu.memory_space<vmem>>, vector<1x1x128xf32>
      %11 = vector.shape_cast %10 : vector<1x1x128xf32> to vector<1x128xf32>
      %12 = vector.shape_cast %9 : vector<1x128xf32> to vector<1x1x128xf32>
      tpu.vector_store %arg8[%c0_6, %c0_7, %c0_8], %12 {strides = array<i32>} : memref<1x1x128xf32, #tpu.memory_space<vmem>>, vector<1x1x128xf32>,
      %cst_9 = arith.constant dense<0.000000e+00> : vector<128xf32>
      %13 = vector.multi_reduction <add>, %9, %cst_9 [0] : vector<1x128xf32> to vector<128xf32>
      %14 = vector.shape_cast %13 : vector<128xf32> to vector<1x128xf32>
      %cst_10 = arith.constant 1.000000e+00 : f32
      %15 = vector.broadcast %cst_10 : f32 to vector<1x128xf32>
      %16 = arith.divf %14, %15 : vector<1x128xf32>
      %17 = arith.subf %9, %16 : vector<1x128xf32>
      %18 = arith.mulf %17, %17 : vector<1x128xf32>
      %cst_11 = arith.constant dense<0.000000e+00> : vector<128xf32>
      %19 = vector.multi_reduction <add>, %18, %cst_11 [0] : vector<1x128xf32> to vector<128xf32>
      %20 = vector.shape_cast %19 : vector<128xf32> to vector<1x128xf32>
      %c0_i32_12 = arith.constant 0 : i32
      %21 = arith.cmpi eq, %arg2, %c0_i32_12 : i32
      %22 = arith.extui %21 : i1 to i32
      %c0_i32_13 = arith.constant 0 : i32
      %23 = arith.cmpi ne, %22, %c0_i32_13 : i32
      scf.if %23 {
        %c0_19 = arith.constant 0 : index
        %c0_20 = arith.constant 0 : index
        %30 = vector.load %arg9[%c0_19, %c0_20] : memref<1x128xf32, #tpu.memory_space<vmem>>, vector<1x128xf32>
        tpu.vector_store %arg9[%c0_19, %c0_20], %16 {strides = array<i32>} : memref<1x128xf32, #tpu.memory_space<vmem>>, vector<1x128xf32>,
        %c0_21 = arith.constant 0 : index
        %c0_22 = arith.constant 0 : index
        %31 = vector.load %arg10[%c0_21, %c0_22] : memref<1x128xf32, #tpu.memory_space<vmem>>, vector<1x128xf32>
        tpu.vector_store %arg10[%c0_21, %c0_22], %20 {strides = array<i32>} : memref<1x128xf32, #tpu.memory_space<vmem>>, vector<1x128xf32>,
      } else {
      }
      %c0_i32_14 = arith.constant 0 : i32
      %24 = arith.cmpi sgt, %arg2, %c0_i32_14 : i32
      %25 = arith.extui %24 : i1 to i32
      %cst_15 = arith.constant 1.000000e+00 : f32
      %c0_i32_16 = arith.constant 0 : i32
      %26 = arith.cmpi ne, %25, %c0_i32_16 : i32
      scf.if %26 {
        %c1_i32_19 = arith.constant 1 : i32
        %30 = arith.muli %arg2, %c1_i32_19 : i32
        %31 = arith.sitofp %30 : i32 to f32
        %32 = arith.addf %31, %cst_15 : f32
        %c0_20 = arith.constant 0 : index
        %c0_21 = arith.constant 0 : index
        %33 = vector.load %arg9[%c0_20, %c0_21] : memref<1x128xf32, #tpu.memory_space<vmem>>, vector<1x128xf32>
        %34 = arith.subf %16, %33 : vector<1x128xf32>
        %c0_22 = arith.constant 0 : index
        %c0_23 = arith.constant 0 : index
        %35 = vector.load %arg9[%c0_22, %c0_23] : memref<1x128xf32, #tpu.memory_space<vmem>>, vector<1x128xf32>
        %36 = arith.divf %cst_15, %32 : f32
        %37 = vector.broadcast %36 : f32 to vector<1x128xf32>
        %38 = arith.mulf %34, %37 : vector<1x128xf32>
        %39 = arith.addf %35, %38 : vector<1x128xf32>
        %c0_24 = arith.constant 0 : index
        %c0_25 = arith.constant 0 : index
        %40 = vector.load %arg9[%c0_24, %c0_25] : memref<1x128xf32, #tpu.memory_space<vmem>>, vector<1x128xf32>
        tpu.vector_store %arg9[%c0_24, %c0_25], %39 {strides = array<i32>} : memref<1x128xf32, #tpu.memory_space<vmem>>, vector<1x128xf32>,
        %c0_26 = arith.constant 0 : index
        %c0_27 = arith.constant 0 : index
        %41 = vector.load %arg10[%c0_26, %c0_27] : memref<1x128xf32, #tpu.memory_space<vmem>>, vector<1x128xf32>
        %42 = arith.addf %41, %20 : vector<1x128xf32>
        %43 = arith.mulf %34, %34 : vector<1x128xf32>
        %44 = arith.mulf %31, %cst_15 : f32
        %45 = arith.divf %44, %32 : f32
        %46 = vector.broadcast %45 : f32 to vector<1x128xf32>
        %47 = arith.mulf %43, %46 : vector<1x128xf32>
        %48 = arith.addf %42, %47 : vector<1x128xf32>
        %c0_28 = arith.constant 0 : index
        %c0_29 = arith.constant 0 : index
        %49 = vector.load %arg10[%c0_28, %c0_29] : memref<1x128xf32, #tpu.memory_space<vmem>>, vector<1x128xf32>
        tpu.vector_store %arg10[%c0_28, %c0_29], %48 {strides = array<i32>} : memref<1x128xf32, #tpu.memory_space<vmem>>, vector<1x128xf32>,
      } else {
      }
      %c0_i32_17 = arith.constant 0 : i32
      %27 = arith.cmpi eq, %arg2, %c0_i32_17 : i32
      %28 = arith.extui %27 : i1 to i32
      %c0_i32_18 = arith.constant 0 : i32
      %29 = arith.cmpi ne, %28, %c0_i32_18 : i32
      scf.if %29 {
        %c0_19 = arith.constant 0 : index
        %c0_20 = arith.constant 0 : index
        %30 = vector.load %arg9[%c0_19, %c0_20] : memref<1x128xf32, #tpu.memory_space<vmem>>, vector<1x128xf32>
        %c0_21 = arith.constant 0 : index
        %c0_22 = arith.constant 0 : index
        %31 = vector.load %arg10[%c0_21, %c0_22] : memref<1x128xf32, #tpu.memory_space<vmem>>, vector<1x128xf32>
        %c0_23 = arith.constant 0 : index
        %c0_24 = arith.constant 0 : index
        %32 = vector.load %arg5[%c0_23, %c0_24] : memref<2x128xf32, #tpu.memory_space<vmem>>, vector<2x128xf32>
        %c0_25 = arith.constant 0 : index
        %c0_26 = arith.constant 0 : index
        %33 = vector.load %arg6[%c0_25, %c0_26] : memref<128x128xf32, #tpu.memory_space<vmem>>, vector<128x128xf32>
        %cst_27 = arith.constant dense<0.000000e+00> : vector<1x128xf32>
        %34 = tpu.matmul %30, %33, %cst_27 {dimension_numbers = #tpu.dot_dimension_numbers<[1], [0], [0], [1], [0, 0, 1, 1], [], []>} : vector<1x128xf32>, vector<128x128xf32>, vector<1x128xf32> -> vector<1x128xf32>
        %cst_28 = arith.constant 4.000000e+00 : f32
        %35 = vector.broadcast %cst_28 : f32 to vector<1x128xf32>
        %36 = arith.divf %34, %35 : vector<1x128xf32>
        %cst_29 = arith.constant dense<0.000000e+00> : vector<1x128xf32>
        %37 = tpu.matmul %31, %33, %cst_29 {dimension_numbers = #tpu.dot_dimension_numbers<[1], [0], [0], [1], [0, 0, 1, 1], [], []>} : vector<1x128xf32>, vector<128x128xf32>, vector<1x128xf32> -> vector<1x128xf32>
        %38 = arith.subf %30, %36 : vector<1x128xf32>
        %39 = arith.mulf %38, %38 : vector<1x128xf32>
        %cst_30 = arith.constant dense<0.000000e+00> : vector<1x128xf32>
        %40 = tpu.matmul %39, %33, %cst_30 {dimension_numbers = #tpu.dot_dimension_numbers<[1], [0], [0], [1], [0, 0, 1, 1], [], []>} : vector<1x128xf32>, vector<128x128xf32>, vector<1x128xf32> -> vector<1x128xf32>
        %cst_31 = arith.constant 1.000000e+00 : f32
        %41 = vector.broadcast %cst_31 : f32 to vector<1x128xf32>
        %42 = arith.mulf %41, %40 : vector<1x128xf32>
        %43 = arith.addf %37, %42 : vector<1x128xf32>
        %cst_32 = arith.constant 4.000000e+00 : f32
        %44 = vector.broadcast %cst_32 : f32 to vector<1x128xf32>
        %45 = arith.divf %43, %44 : vector<1x128xf32>
        %cst_33 = arith.constant 9.99999974E-6 : f32
        %46 = vector.broadcast %cst_33 : f32 to vector<1x128xf32>
        %47 = arith.addf %45, %46 : vector<1x128xf32>
        %48 = math.rsqrt %47 : vector<1x128xf32>
        %49 = vector.extract_strided_slice %32 {offsets = [0, 0], sizes = [1, 128], strides = [1, 1]} : vector<2x128xf32> to vector<1x128xf32>
        %50 = arith.mulf %49, %48 : vector<1x128xf32>
        %51 = vector.extract_strided_slice %32 {offsets = [1, 0], sizes = [1, 128], strides = [1, 1]} : vector<2x128xf32> to vector<1x128xf32>
        %52 = arith.mulf %36, %50 : vector<1x128xf32>
        %53 = arith.subf %51, %52 : vector<1x128xf32>
        %c0_34 = arith.constant 0 : index
        %c0_35 = arith.constant 0 : index
        %54 = vector.load %arg11[%c0_34, %c0_35] : memref<2x128xf32, #tpu.memory_space<vmem>>, vector<1x128xf32>
        tpu.vector_store %arg11[%c0_34, %c0_35], %50 {strides = array<i32>} : memref<2x128xf32, #tpu.memory_space<vmem>>, vector<1x128xf32>,
        %c1 = arith.constant 1 : index
        %c0_36 = arith.constant 0 : index
        %55 = vector.load %arg11[%c1, %c0_36] : memref<2x128xf32, #tpu.memory_space<vmem>>, vector<1x128xf32>
        tpu.vector_store %arg11[%c1, %c0_36], %53 {strides = array<i32>} : memref<2x128xf32, #tpu.memory_space<vmem>>, vector<1x128xf32>,
      } else {
      }
    } else {
    }
    %c1_i32 = arith.constant 1 : i32
    %3 = arith.cmpi eq, %arg1, %c1_i32 : i32
    %4 = arith.extui %3 : i1 to i32
    %c0_i32_1 = arith.constant 0 : i32
    %5 = arith.cmpi ne, %4, %c0_i32_1 : i32
    scf.if %5 {
      %c0 = arith.constant 0 : index
      %c0_2 = arith.constant 0 : index
      %c0_3 = arith.constant 0 : index
      %6 = vector.load %arg8[%c0, %c0_2, %c0_3] : memref<1x1x128xf32, #tpu.memory_space<vmem>>, vector<1x1x128xf32>
      %7 = vector.shape_cast %6 : vector<1x1x128xf32> to vector<1x128xf32>
      %c0_4 = arith.constant 0 : index
      %c0_5 = arith.constant 0 : index
      %8 = vector.load %arg11[%c0_4, %c0_5] : memref<2x128xf32, #tpu.memory_space<vmem>>, vector<1x128xf32>
      %9 = arith.mulf %7, %8 : vector<1x128xf32>
      %c1 = arith.constant 1 : index
      %c0_6 = arith.constant 0 : index
      %10 = vector.load %arg11[%c1, %c0_6] : memref<2x128xf32, #tpu.memory_space<vmem>>, vector<1x128xf32>
      %11 = arith.addf %9, %10 : vector<1x128xf32>
      %cst = arith.constant 0.000000e+00 : f32
      %12 = vector.broadcast %cst : f32 to vector<1x128xf32>
      %13 = arith.cmpf oge, %11, %12 : vector<1x128xf32>
      %cst_7 = arith.constant 3.000000e-01 : f32
      %14 = vector.broadcast %cst_7 : f32 to vector<1x128xf32>
      %15 = arith.mulf %11, %14 : vector<1x128xf32>
      %16 = arith.select %13, %11, %15 : vector<1x128xi1>, vector<1x128xf32>
      %c0_8 = arith.constant 0 : index
      %c0_9 = arith.constant 0 : index
      %c0_10 = arith.constant 0 : index
      %17 = vector.load %arg7[%c0_8, %c0_9, %c0_10] : memref<1x1x128xf32, #tpu.memory_space<vmem>>, vector<1x1x128xf32>
      %18 = vector.shape_cast %17 : vector<1x1x128xf32> to vector<1x128xf32>
      %19 = vector.shape_cast %16 : vector<1x128xf32> to vector<1x1x128xf32>
      tpu.vector_store %arg7[%c0_8, %c0_9, %c0_10], %19 {strides = array<i32>} : memref<1x1x128xf32, #tpu.memory_space<vmem>>, vector<1x1x128xf32>,
    } else {
    }
    return
  }
  func.func @transform_0(%arg0: i32, %arg1: i32, %arg2: i32) -> (i32, i32, i32) {
    %c1_i32 = arith.constant 1 : i32
    %0 = arith.subi %c1_i32, %arg1 : i32
    %1 = arith.muli %arg2, %0 : i32
    %c0_i32 = arith.constant 0 : i32
    %2 = arith.muli %c0_i32, %arg1 : i32
    %3 = arith.addi %1, %2 : i32
    %c0_i32_0 = arith.constant 0 : i32
    %c0_i32_1 = arith.constant 0 : i32
    return %arg0, %3, %c0_i32_0 : i32, i32, i32
  }
  func.func @transform_1(%arg0: i32, %arg1: i32, %arg2: i32) -> (i32, i32) {
    %c0_i32 = arith.constant 0 : i32
    %c0_i32_0 = arith.constant 0 : i32
    %c0_i32_1 = arith.constant 0 : i32
    return %c0_i32, %c0_i32_0 : i32, i32
  }
  func.func @transform_2(%arg0: i32, %arg1: i32, %arg2: i32) -> (i32, i32) {
    %c0_i32 = arith.constant 0 : i32
    %c0_i32_0 = arith.constant 0 : i32
    %c0_i32_1 = arith.constant 0 : i32
    return %c0_i32, %c0_i32_0 : i32, i32
  }
  func.func @transform_3(%arg0: i32, %arg1: i32, %arg2: i32) -> (i32, i32) {
    %c0_i32 = arith.constant 0 : i32
    %c0_i32_0 = arith.constant 0 : i32
    %c0_i32_1 = arith.constant 0 : i32
    return %c0_i32, %c0_i32_0 : i32, i32
  }
  func.func @transform_4(%arg0: i32, %arg1: i32, %arg2: i32) -> (i32, i32, i32) {
    %0 = arith.muli %arg2, %arg1 : i32
    %c0_i32 = arith.constant 0 : i32
    %c0_i32_0 = arith.constant 0 : i32
    return %arg0, %0, %c0_i32 : i32, i32, i32
  }
}

</mosaic_0001>

<bundles_post_ra>
// kernel: _lambda_.3
= control target key start
LH: loop header
LB: loop body
LE: loop exit
PB: predicated region body
PF: predicated region fallthrough
CT: control target
= control target key end

     0   :  { %s1205_s15 = smov 0   ;;  %s1207_s16 = smov 0   ;;  %s1465_s0 = inlined_call_operand.vmem [shape: f32[2,4,256], index: 0, kind: input, shape index: {}]   ;;  %s1466_s1 = inlined_call_operand.vmem [shape: f32[256,128], index: 1, kind: input, shape index: {}]   ;;  %s1467_s2 = inlined_call_operand.vmem [shape: f32[2,128], index: 2, kind: input, shape index: {}]   ;;  %s1468_s3 = inlined_call_operand.vmem [shape: f32[128,128], index: 3, kind: input, shape index: {}]   ;;  %s1469_s4 = inlined_call_operand.vmem [shape: f32[2,4,128], index: 4, kind: output, shape index: {}]  }
   0x1   :  { %s1209_s17 = smov 0   ;;  %s1211_s18 = smov 0  }
   0x2   :  { %s1213_s19 = smov 0  }
   0x3 LB: > { %s29_s20 = sadd.s32 1, %s1167_s17  ;;  %s33_s21 = sadd.s32 1, %s1171_s18  ;;  %s1175_s19 = sphi %s1213_s19, %s14_s19   ;;  %s1171_s18 = sphi %s1211_s18, %s1473_s18   ;;  %s1167_s17 = sphi %s1209_s17, %s1472_s17   ;;  %s1163_s16 = sphi %s1207_s16, %s1471_s16   ;;  %s1159_s15 = sphi %s1205_s15, %s1470_s15  }
   0x4   : > { %p31_p0 = scmp.ge.s32.totalorder %s29_s20, 2  ;;  %p785_p1 = scmp.ge.s32.totalorder %s1175_s19, 1 }
   0x5   : > { %p199_p2 = scmp.lt.s32.totalorder %s1175_s19, 5 }
   0x6   : > { %s1475_s20 = smov (%p31_p0, %s29_s20), 0  ;;  %s1477_s21 = smov (!%p31_p0, %s33_s21), %s1171_s18 }
   0x7   : > { %p200_p3 = pnand %p785_p1, %p199_p2  ;;  %p35_p4 = scmp.ge.s32.totalorder %s1477_s21, 2 }
   0x8   : > { %p236_p5 = scmp.lt.s32.totalorder (!%p200_p3), %s1163_s16, 1  ;;  %p789_p6 = scmp.ne.s32.totalorder (!%p200_p3), %s1159_s15, 0 }
   0x9   : > { %s1479_s21 = smov (%p35_p4, %s1477_s21), 0  ;;  %203 = sbr.rel (%p200_p3) target bundleno = 761 (0x2f9), region = 36 }
  0x10   : > { %s1481_s16 = smov (!%p236_p5, %s1163_s16), 1  ;;  %259 = sbr.rel (%p789_p6) target bundleno = 748 (0x2ec), region = 40 }
  0x11   : > { %s795_s22 = sshll.u32 %s1481_s16, 3  ;;  %s788_s23 = sshll.u32 %s1481_s16, 2  ;;  %v277_v0 = vld [vmem:[%s1466_s1 + $0x80] sm:$0xff] (!%p789_p6)  ;;  %v278_v1 = vld [vmem:[%s1466_s1 + $0x88] sm:$0xff] (!%p789_p6)  ;;  %v279_v5 = vld [vmem:[%s1466_s1 + $0x90] sm:$0xff] (!%p789_p6)  ;;  %v1177_v7 = vmov (!%p789_p6), 0.0|0.0  }
  0x12   : > { %s1240_s26 = scalar_lea.vmem %s1465_s0, %s795_s22  ;;  %s1245_s29 = scalar_lea.vmem %s1469_s4, %s788_s23  ;;  %v261_v2 = vld [vmem:[%s1466_s1] sm:$0xff] (!%p789_p6)  ;;  %v987_v3 = vpack.c.bf16 (!%p789_p6), %v278_v1, %v277_v0  ;;  %v262_v4 = vld [vmem:[%s1466_s1 + $0x8] sm:$0xff] (!%p789_p6)  ;;  %v280_v6 = vld [vmem:[%s1466_s1 + $0x98] sm:$0xff] (!%p789_p6)  ;;  %1019 = vmatprep.subr.bf16.mxu1 (!%p789_p6), %v1177_v7  ;;  %vm1178_vm0 = vmmov (!%p789_p6), 0   ;;  %vm367_vm1 = vcmask (!%p789_p6), 1043456  }
  0x13   : > { %v989_v8 = vpack.c.bf16 (!%p789_p6), %v262_v4, %v261_v2  ;;  %v991_v9 = vpack.c.bf16 (!%p789_p6), %v280_v6, %v279_v5  ;;  %v263_v10 = vld [vmem:[%s1466_s1 + $0x10] sm:$0xff] (!%p789_p6)  ;;  %v264_v11 = vld [vmem:[%s1466_s1 + $0x18] sm:$0xff] (!%p789_p6)  ;;  %v281_v12 = vld [vmem:[%s1466_s1 + $0xa0] sm:$0xff] (!%p789_p6) }
  0x14   : > { %988 = vmatprep.subr.bf16.mxu0 (!%p789_p6), %v987_v3  ;;  %v282_v13 = vld [vmem:[%s1466_s1 + $0xa8] sm:$0xff] (!%p789_p6)  ;;  %v993_v14 = vpack.c.bf16 (!%p789_p6), %v264_v11, %v263_v10  ;;  %v265_v16 = vld [vmem:[%s1466_s1 + $0x20] sm:$0xff] (!%p789_p6)  ;;  %v283_v18 = vld [vmem:[%s1466_s1 + $0xb0] sm:$0xff] (!%p789_p6) }
  0x15   : > { %990 = vmatpush3.bf16.msra.mxu0 (!%p789_p6), %v989_v8  ;;  %v995_v15 = vpack.c.bf16 (!%p789_p6), %v282_v13, %v281_v12  ;;  %v266_v17 = vld [vmem:[%s1466_s1 + $0x28] sm:$0xff] (!%p789_p6)  ;;  %v284_v19 = vld [vmem:[%s1466_s1 + $0xb8] sm:$0xff] (!%p789_p6)  ;;  %v267_v22 = vld [vmem:[%s1466_s1 + $0x30] sm:$0xff] (!%p789_p6)  ;;  %v1179_v12 = vmov (!%p789_p6), 0.0  }
  0x16   : > { %992 = vmatprep.subr.bf16.mxu0 (!%p789_p6), %v991_v9  ;;  %v997_v20 = vpack.c.bf16 (!%p789_p6), %v266_v17, %v265_v16  ;;  %v999_v21 = vpack.c.bf16 (!%p789_p6), %v284_v19, %v283_v18  ;;  %v268_v23 = vld [vmem:[%s1466_s1 + $0x38] sm:$0xff] (!%p789_p6)  ;;  %v285_v24 = vld [vmem:[%s1466_s1 + $0xc0] sm:$0xff] (!%p789_p6)  ;;  %v286_v25 = vld [vmem:[%s1466_s1 + $0xc8] sm:$0xff] (!%p789_p6)  ;;  %914 = vmatprep.mubr.msk.f32.mxu1 (!%p789_p6), %vm1178_vm0, %v1179_v12 }
  0x17   : > { %v260_v26 = vld [vmem:[%s1240_s26] sm:$0xff]  ;;  %v428_v29 = vld [vmem:[%s1468_s3 + $0x8] sm:$0xff]  ;;  %v429_v30 = vld [vmem:[%s1468_s3 + $0x10] sm:$0xff]  ;;  %v1001_v31 = vpack.c.bf16 %v268_v23, %v267_v22  ;;  %v1003_v34 = vpack.c.bf16 %v286_v25, %v285_v24 }
  0x18   : > { %v294_v27 = vcombine.high %v260_v26, %v260_v26  ;;  %v427_v28 = vld [vmem:[%s1468_s3] sm:$0xff]  ;;  %v430_v33 = vld [vmem:[%s1468_s3 + $0x18] sm:$0xff]  ;;  %v270_v36 = vld [vmem:[%s1466_s1 + $0x48] sm:$0xff] }
  0x19   : > { %994 = vmatpush3.bf16.msra.mxu0 %v993_v14  ;;  %v1313_v32 = vpack.c.bf16 %v428_v29, %v427_v28  ;;  %v269_v35 = vld [vmem:[%s1466_s1 + $0x40] sm:$0xff]  ;;  %v287_v37 = vld [vmem:[%s1466_s1 + $0xd0] sm:$0xff]  ;;  %v288_v38 = vld [vmem:[%s1466_s1 + $0xd8] sm:$0xff]  ;;  %v1331_v39 = vpack.c.bf16 %v430_v33, %v429_v30 }
  0x1a   : > { %996 = vmatprep.subr.bf16.mxu0 %v995_v15  ;;  %360 = vmatprep.mubr.f32.mxu0 %v294_v27  ;;  %v1005_v40 = vpack.c.bf16 %v270_v36, %v269_v35  ;;  %v1007_v41 = vpack.c.bf16 %v288_v38, %v287_v37  ;;  %v271_v42 = vld [vmem:[%s1466_s1 + $0x50] sm:$0xff]  ;;  %v272_v43 = vld [vmem:[%s1466_s1 + $0x58] sm:$0xff]  ;;  %v289_v44 = vld [vmem:[%s1466_s1 + $0xe0] sm:$0xff] }
  0x1b   : > { %1021 = vmatpush3.bf16.msra.mxu1 %v1313_v32  ;;  %v290_v45 = vld [vmem:[%s1466_s1 + $0xe8] sm:$0xff]  ;;  %v1009_v46 = vpack.c.bf16 %v272_v43, %v271_v42  ;;  %v273_v48 = vld [vmem:[%s1466_s1 + $0x60] sm:$0xff]  ;;  %v291_v50 = vld [vmem:[%s1466_s1 + $0xf0] sm:$0xff] }
  0x1c   : > { %1022 = vmatprep.subr.bf16.mxu1 %v1177_v7  ;;  %v1011_v47 = vpack.c.bf16 %v290_v45, %v289_v44  ;;  %v274_v49 = vld [vmem:[%s1466_s1 + $0x68] sm:$0xff]  ;;  %v292_v51 = vld [vmem:[%s1466_s1 + $0xf8] sm:$0xff]  ;;  %v275_v54 = vld [vmem:[%s1466_s1 + $0x70] sm:$0xff] }
  0x1d   : > { %998 = vmatpush3.bf16.msra.mxu0 %v997_v20  ;;  %v1013_v52 = vpack.c.bf16 %v274_v49, %v273_v48  ;;  %v1015_v53 = vpack.c.bf16 %v292_v51, %v291_v50  ;;  %v276_v55 = vld [vmem:[%s1466_s1 + $0x78] sm:$0xff]  ;;  %v431_v57 = vld [vmem:[%s1468_s3 + $0x20] sm:$0xff]  ;;  %v432_v58 = vld [vmem:[%s1468_s3 + $0x28] sm:$0xff] }
  0x1e   : > { %1000 = vmatprep.subr.bf16.mxu0 %v999_v21  ;;  %v1017_v56 = vpack.c.bf16 %v276_v55, %v275_v54  ;;  %v1377_v59 = vpack.c.bf16 %v432_v58, %v431_v57  ;;  %v433_v60 = vld [vmem:[%s1468_s3 + $0x30] sm:$0xff]  ;;  %v434_v61 = vld [vmem:[%s1468_s3 + $0x38] sm:$0xff]  ;;  %v435_v63 = vld [vmem:[%s1468_s3 + $0x40] sm:$0xff] }
  0x1f   : > { %1024 = vmatpush3.bf16.msra.mxu1 %v1331_v39  ;;  %v1389_v62 = vpack.c.bf16 %v434_v61, %v433_v60  ;;  %v436_v0 = vld [vmem:[%s1468_s3 + $0x48] sm:$0xff]  ;;  %v437_v2 = vld [vmem:[%s1468_s3 + $0x50] sm:$0xff]  ;;  %v438_v3 = vld [vmem:[%s1468_s3 + $0x58] sm:$0xff] }
  0x20   : > { %1025 = vmatprep.subr.bf16.mxu1 %v1177_v7  ;;  %v1401_v1 = vpack.c.bf16 %v436_v0, %v435_v63  ;;  %v1035_v4 = vpack.c.bf16 %v438_v3, %v437_v2  ;;  %v439_v5 = vld [vmem:[%s1468_s3 + $0x60] sm:$0xff]  ;;  %v440_v6 = vld [vmem:[%s1468_s3 + $0x68] sm:$0xff]  ;;  %v441_v9 = vld [vmem:[%s1468_s3 + $0x70] sm:$0xff] }
  0x21   : > { %1002 = vmatpush3.bf16.msra.mxu0 %v1001_v31  ;;  %v1038_v8 = vpack.c.bf16 %v440_v6, %v439_v5  ;;  %v442_v10 = vld [vmem:[%s1468_s3 + $0x78] sm:$0xff] }
  0x22   : > { %1004 = vmatprep.subr.bf16.mxu0 %v1003_v34  ;;  %v1041_v11 = vpack.c.bf16 %v442_v10, %v441_v9 }
  0x23   : > { %1027 = vmatpush3.bf16.msra.mxu1 %v1377_v59 }
  0x24   : > { %1028 = vmatprep.subr.bf16.mxu1 %v1177_v7 }
  0x25   : > { %1006 = vmatpush3.bf16.msra.mxu0 %v1005_v40 }
  0x26   : > { %1008 = vmatprep.subr.bf16.mxu0 %v1007_v41 }
  0x27   : > { %1030 = vmatpush3.bf16.msra.mxu1 %v1389_v62 }
  0x28   : > { %1031 = vmatprep.subr.bf16.mxu1 %v1177_v7 }
  0x29   : > { %1010 = vmatpush3.bf16.msra.mxu0 %v1009_v46 }
  0x2a   : > { %1012 = vmatprep.subr.bf16.mxu0 %v1011_v47 }
  0x2b   : > { %1033 = vmatpush3.bf16.msra.mxu1 %v1401_v1 }
  0x2c   : > { %1034 = vmatprep.subr.bf16.mxu1 %v1177_v7 }
  0x2d   : > { %1014 = vmatpush3.bf16.msra.mxu0 %v1013_v52 }
  0x2e   : > { %1016 = vmatprep.subr.bf16.mxu0 %v1015_v53 }
  0x2f   : > { %1036 = vmatpush3.bf16.msra.mxu1 %v1035_v4 }
  0x30   : > { %1037 = vmatprep.subr.bf16.mxu1 %v1177_v7 }
  0x31   : > { %1018 = vmatpush3.bf16.msra.mxu0 %v1017_v56 }
  0x32   : > { %1043 = vmatprep.subr.bf16.mxu0 %v1177_v7 }
  0x33   : > { %1039 = vmatpush3.bf16.msra.mxu1 %v1038_v8 }
  0x34   : > { %361 = vmatmul.mubr.f32.vlgmr.msra.gmra.mrb[0].mxu0 %v260_v26  ;;  %1040 = vmatprep.subr.bf16.mxu1 %v1177_v7 }
  0x35   : > { %1045 = vmatpush3.bf16.msra.mxu0 %v1313_v32  ;;  %949 = vmatprep.mubr.msk.f32.mxu0 %vm1178_vm0, %v1179_v12 }
  0x36   : > { %1046 = vmatprep.subr.bf16.mxu0 %v1177_v7 }
  0x37   : > { %1042 = vmatpush3.bf16.msra.mxu1 %v1041_v11 }
  0x38   : > { %1067 = vmatprep.subr.bf16.mxu1 %v1177_v7 }
  0x39   : > { %1048 = vmatpush3.bf16.msra.mxu0 %v1331_v39 }
  0x3a   : > { %1049 = vmatprep.subr.bf16.mxu0 %v1177_v7 }
  0x3d   : > { %1051 = vmatpush3.bf16.msra.mxu0 %v1377_v59 }
  0x3e   : > { %1052 = vmatprep.subr.bf16.mxu0 %v1177_v7 }
  0x41   : > { %1054 = vmatpush3.bf16.msra.mxu0 %v1389_v62 }
  0x42   : > { %1055 = vmatprep.subr.bf16.mxu0 %v1177_v7 }
  0x45   : > { %1057 = vmatpush3.bf16.msra.mxu0 %v1401_v1 }
  0x46   : > { %1058 = vmatprep.subr.bf16.mxu0 %v1177_v7 }
  0x49   : > { %1060 = vmatpush3.bf16.msra.mxu0 %v1035_v4 }
  0x4a   : > { %1061 = vmatprep.subr.bf16.mxu0 %v1177_v7 }
  0x4d   : > { %1063 = vmatpush3.bf16.msra.mxu0 %v1038_v8 }
  0x4e   : > { %1064 = vmatprep.subr.bf16.mxu0 %v1177_v7 }
  0x51   : > { %1066 = vmatpush3.bf16.msra.mxu0 %v1041_v11 }
 0x107   : > { %v828_v13 = vpop.f32.mrb[0].mxu0 }
 0x108   : > { %v829_v14 = vpop.f32.mrb[1].mxu0 }
 0x109   : > { %v830_v15 = vadd.f32 %v829_v14, %v828_v13 }
 0x10b   : > { %366 = vst [vmem:[#allocation2] sm:$0xf] %v830_v15  ;;  %v368_v16 = vsel %vm367_vm1, %v830_v15, 0.0 }
 0x10c   : > { %v369_v17 = vrot.slane %v368_v16, 4 }
 0x10e   : > { %v370_v18 = vadd.f32 %v369_v17, %v368_v16 }
 0x110   : > { %v371_v19 = vrot.slane %v370_v18, 2 }
 0x112   : > { %v372_v20 = vadd.f32 %v371_v19, %v370_v18 }
 0x114   : > { %v373_v21 = vrot.slane %v372_v20, 1 }
 0x116   : > { %v374_v22 = vadd.f32 %v373_v21, %v372_v20 }
 0x118   : > { %v376_v23 = vmul.f32 0.25, %v374_v22 }
 0x11a   : > { %v377_v24 = vsub.f32 %v830_v15, %v376_v23  ;;  %390 = vst [vmem:[#allocation3] sm:$0x1] %v376_v23 }
 0x11c   : > { %v378_v25 = vmul.f32 %v377_v24, %v377_v24 }
 0x11e   : > { %v379_v26 = vsel %vm367_vm1, %v378_v25, 0.0 }
 0x11f   : > { %v380_v27 = vrot.slane %v379_v26, 4 }
 0x121   : > { %v381_v28 = vadd.f32 %v380_v27, %v379_v26  ;;  %v424_v29 = vld [vmem:[#allocation3] sm:$0x1] }
 0x122   : > { %915 = vmatmul.mubr.f32.vlgmr.msra.gmra.mrb[0].mxu1 %v424_v29 }
 0x123   : > { %v382_v30 = vrot.slane %v381_v28, 2  ;;  %1069 = vmatpush3.bf16.msra.mxu1 %v1313_v32  ;;  %984 = vmatprep.mubr.msk.f32.mxu1 %vm1178_vm0, %v1179_v12 }
 0x124   : > { %1070 = vmatprep.subr.bf16.mxu1 %v1177_v7 }
 0x125   : > { %v383_v31 = vadd.f32 %v382_v30, %v381_v28 }
 0x127   : > { %v384_v33 = vrot.slane %v383_v31, 1  ;;  %1072 = vmatpush3.bf16.msra.mxu1 %v1331_v39 }
 0x128   : > { %1073 = vmatprep.subr.bf16.mxu1 %v1177_v7 }
 0x129   : > { %v385_v34 = vadd.f32 %v384_v33, %v383_v31 }
 0x12b   : > { %391 = vst [vmem:[#allocation4] sm:$0x1] %v385_v34  ;;  %1075 = vmatpush3.bf16.msra.mxu1 %v1377_v59 }
 0x12c   : > { %1076 = vmatprep.subr.bf16.mxu1 %v1177_v7 }
 0x12f   : > { %1078 = vmatpush3.bf16.msra.mxu1 %v1389_v62 }
 0x130   : > { %1079 = vmatprep.subr.bf16.mxu1 %v1177_v7 }
 0x132   : > { %v425_v32 = vld [vmem:[#allocation4] sm:$0x1] }
 0x133   : > { %1081 = vmatpush3.bf16.msra.mxu1 %v1401_v1 }
 0x134   : > { %1082 = vmatprep.subr.bf16.mxu1 %v1177_v7 }
 0x137   : > { %1084 = vmatpush3.bf16.msra.mxu1 %v1035_v4 }
 0x138   : > { %1085 = vmatprep.subr.bf16.mxu1 %v1177_v7 }
 0x13b   : > { %1087 = vmatpush3.bf16.msra.mxu1 %v1038_v8 }
 0x13c   : > { %1088 = vmatprep.subr.bf16.mxu1 %v1177_v7  ;;  %v426_v7 = vld [vmem:[%s1467_s2] sm:$0x3] }
 0x13f   : > { %1090 = vmatpush3.bf16.msra.mxu1 %v1041_v11 }
 0x142   : > { %985 = vmatmul.mubr.f32.vlgmr.msra.gmra.mrb[2].mxu1 %v425_v32 }
 0x1f5   : > { %v509_v35 = vpop.f32.mrb[0].mxu1 }
 0x1f6   : > { %v514_v36 = vmul.f32 0.0625, %v509_v35  ;;  %v916_v37 = vpop.f32.mrb[1].mxu1 }
 0x1f8   : > { %v515_v38 = vsub.f32 %v424_v29, %v514_v36 }
 0x1fa   : > { %v516_v39 = vmul.f32 %v515_v38, %v515_v38 }
 0x1fc   : > { %950 = vmatmul.mubr.f32.vlgmr.msra.gmra.mrb[2].mxu0 %v516_v39 }
 0x215   : > { %v654_v40 = vpop.f32.mrb[2].mxu1 }
 0x216   : > { %v986_v41 = vpop.f32.mrb[3].mxu1 }
 0x2cf   : > { %v583_v42 = vpop.f32.mrb[2].mxu0 }
 0x2d0   : > { %v587_v43 = vmul.f32 4.0, %v583_v42  ;;  %v951_v44 = vpop.f32.mrb[3].mxu0 }
 0x2d2   : > { %v655_v45 = vadd.f32 %v654_v40, %v587_v43 }
 0x2d4   : > { %v659_v46 = vmul.f32 0.015625, %v655_v45 }
 0x2d6   : > { %v660_v47 = vadd.f32 1e-05, %v659_v46 }
 0x2d8   : > { %1135 = vrsqrt.f32 %v660_v47 }
 0x2e2   : > { %v1136_v48 = vpop.eup %1135 }
 0x2e3   : > { %v662_v49 = vmul.f32 %v1136_v48, %v426_v7 }
 0x2e5   : > { %v663_v50 = vmul.f32 %v662_v49, %v514_v36  ;;  %668 = vst [vmem:[#allocation5] sm:$0x1] %v662_v49 }
 0x2e7   : > { %v665_v51 = vrot.slane %v663_v50, 7 }
 0x2e9   : > { %v667_v52 = vsub.f32 %v426_v7, %v665_v51 }
 0x2eb   : > { %669 = vst [vmem:[#allocation5] sm:$0x2] %v667_v52 }
 0x2ec PF: > { %p790_p7 = scmp.ne.s32.totalorder %s1159_s15, 1 }
 0x2ed   : > { %v674_v53 = vld [vmem:[#allocation2] sm:$0xf] (!%p790_p7)  ;;  %v791_v54 = vld [vmem:[#allocation5] ss:$0 sm:$0xff] (!%p790_p7) }
 0x2ee   : > { %673 = sbr.rel (%p790_p7) target bundleno = 761 (0x2f9), region = 56  ;;  %v680_v56 = vmul.f32 (!%p790_p7), %v791_v54, %v674_v53 }
 0x2f2   : > { %v792_v55 = vld [vmem:[#allocation5 + $0x1] ss:$0 sm:$0xff] (!%p790_p7) }
 0x2f3   : > { %v686_v57 = vadd.f32 (!%p790_p7), %v792_v55, %v680_v56 }
 0x2f5   : > { %vm687_vm2 = vcmp.ge.f32.partialorder %v686_v57, 0.0  ;;  %v688_v58 = vmul.f32 0.3, %v686_v57 }
 0x2f7   : > { %v689_v59 = vsel %vm687_vm2, %v686_v57, %v688_v58 }
 0x2f8   : > { %690 = vst [vmem:[%s1245_s29] sm:$0xf] %v689_v59 }
 0x2f9 PF: > { %s14_s19 = sadd.s32 1, %s1175_s19   ;;  %s1470_s15 = smov %s1167_s17 }
 0x2fa   : > { %p11_p8 = scmp.ge.s32.totalorder %s14_s19, 6   ;;  %s1471_s16 = smov %s1171_s18 }
 0x2fb   : > { %s1472_s17 = smov %s1475_s20  ;;  %s1473_s18 = smov %s1479_s21 }
 0x2fc   :  { %13 = sbr.rel (!%p11_p8) target bundleno = 3 (0x3), region = 86 }

// kernel: _lambda_.4
= control target key start
LH: loop header
LB: loop body
LE: loop exit
PB: predicated region body
PF: predicated region fallthrough
CT: control target
= control target key end

     0   :  { %s1213_s15 = smov 0   ;;  %s1215_s16 = smov 0   ;;  %s1473_s0 = inlined_call_operand.vmem [shape: f32[2,2,256], index: 0, kind: input, shape index: {}]   ;;  %s1474_s1 = inlined_call_operand.vmem [shape: f32[256,128], index: 1, kind: input, shape index: {}]   ;;  %s1475_s2 = inlined_call_operand.vmem [shape: f32[2,128], index: 2, kind: input, shape index: {}]   ;;  %s1476_s3 = inlined_call_operand.vmem [shape: f32[128,128], index: 3, kind: input, shape index: {}]   ;;  %s1477_s4 = inlined_call_operand.vmem [shape: f32[2,2,128], index: 4, kind: output, shape index: {}]  }
   0x1   :  { %s1217_s17 = smov 0   ;;  %s1219_s18 = smov 0  }
   0x2   :  { %s1221_s19 = smov 0  }
   0x3 LB: > { %s29_s20 = sadd.s32 1, %s1175_s17  ;;  %s33_s21 = sadd.s32 1, %s1179_s18  ;;  %s1183_s19 = sphi %s1221_s19, %s14_s19   ;;  %s1179_s18 = sphi %s1219_s18, %s1481_s18   ;;  %s1175_s17 = sphi %s1217_s17, %s1480_s17   ;;  %s1171_s16 = sphi %s1215_s16, %s1479_s16   ;;  %s1167_s15 = sphi %s1213_s15, %s1478_s15  }
   0x4   : > { %p31_p0 = scmp.ge.s32.totalorder %s29_s20, 2  ;;  %p793_p1 = scmp.ge.s32.totalorder %s1183_s19, 1 }
   0x5   : > { %p199_p2 = scmp.lt.s32.totalorder %s1183_s19, 5 }
   0x6   : > { %s1483_s20 = smov (%p31_p0, %s29_s20), 0  ;;  %s1485_s21 = smov (!%p31_p0, %s33_s21), %s1179_s18 }
   0x7   : > { %p200_p3 = pnand %p793_p1, %p199_p2  ;;  %p35_p4 = scmp.ge.s32.totalorder %s1485_s21, 2 }
   0x8   : > { %p236_p5 = scmp.lt.s32.totalorder (!%p200_p3), %s1171_s16, 1  ;;  %p797_p6 = scmp.ne.s32.totalorder (!%p200_p3), %s1167_s15, 0 }
   0x9   : > { %s1487_s21 = smov (%p35_p4, %s1485_s21), 0  ;;  %203 = sbr.rel (%p200_p3) target bundleno = 761 (0x2f9), region = 36 }
  0x10   : > { %s1489_s16 = smov (!%p236_p5, %s1171_s16), 1  ;;  %259 = sbr.rel (%p797_p6) target bundleno = 748 (0x2ec), region = 40 }
  0x11   : > { %s804_s22 = sshll.u32 %s1489_s16, 2  ;;  %s796_s23 = sshll.u32 %s1489_s16, 1  ;;  %v277_v0 = vld [vmem:[%s1474_s1 + $0x80] sm:$0xff] (!%p797_p6)  ;;  %v278_v1 = vld [vmem:[%s1474_s1 + $0x88] sm:$0xff] (!%p797_p6)  ;;  %v279_v5 = vld [vmem:[%s1474_s1 + $0x90] sm:$0xff] (!%p797_p6)  ;;  %v1185_v7 = vmov (!%p797_p6), 0.0|0.0  }
  0x12   : > { %s1248_s26 = scalar_lea.vmem %s1473_s0, %s804_s22  ;;  %s1253_s29 = scalar_lea.vmem %s1477_s4, %s796_s23  ;;  %v261_v2 = vld [vmem:[%s1474_s1] sm:$0xff] (!%p797_p6)  ;;  %v996_v3 = vpack.c.bf16 (!%p797_p6), %v278_v1, %v277_v0  ;;  %v262_v4 = vld [vmem:[%s1474_s1 + $0x8] sm:$0xff] (!%p797_p6)  ;;  %v280_v6 = vld [vmem:[%s1474_s1 + $0x98] sm:$0xff] (!%p797_p6)  ;;  %1028 = vmatprep.subr.bf16.mxu1 (!%p797_p6), %v1185_v7  ;;  %vm1186_vm0 = vmmov (!%p797_p6), 0   ;;  %vm375_vm1 = vcmask (!%p797_p6), 1041408  }
  0x13   : > { %v998_v8 = vpack.c.bf16 (!%p797_p6), %v262_v4, %v261_v2  ;;  %v1000_v9 = vpack.c.bf16 (!%p797_p6), %v280_v6, %v279_v5  ;;  %v263_v10 = vld [vmem:[%s1474_s1 + $0x10] sm:$0xff] (!%p797_p6)  ;;  %v264_v11 = vld [vmem:[%s1474_s1 + $0x18] sm:$0xff] (!%p797_p6)  ;;  %v281_v12 = vld [vmem:[%s1474_s1 + $0xa0] sm:$0xff] (!%p797_p6) }
  0x14   : > { %997 = vmatprep.subr.bf16.mxu0 (!%p797_p6), %v996_v3  ;;  %v282_v13 = vld [vmem:[%s1474_s1 + $0xa8] sm:$0xff] (!%p797_p6)  ;;  %v1002_v14 = vpack.c.bf16 (!%p797_p6), %v264_v11, %v263_v10  ;;  %v265_v16 = vld [vmem:[%s1474_s1 + $0x20] sm:$0xff] (!%p797_p6)  ;;  %v283_v18 = vld [vmem:[%s1474_s1 + $0xb0] sm:$0xff] (!%p797_p6) }
  0x15   : > { %999 = vmatpush3.bf16.msra.mxu0 (!%p797_p6), %v998_v8  ;;  %v1004_v15 = vpack.c.bf16 (!%p797_p6), %v282_v13, %v281_v12  ;;  %v266_v17 = vld [vmem:[%s1474_s1 + $0x28] sm:$0xff] (!%p797_p6)  ;;  %v284_v19 = vld [vmem:[%s1474_s1 + $0xb8] sm:$0xff] (!%p797_p6)  ;;  %v267_v22 = vld [vmem:[%s1474_s1 + $0x30] sm:$0xff] (!%p797_p6)  ;;  %v1187_v12 = vmov (!%p797_p6), 0.0  }
  0x16   : > { %1001 = vmatprep.subr.bf16.mxu0 (!%p797_p6), %v1000_v9  ;;  %v1006_v20 = vpack.c.bf16 (!%p797_p6), %v266_v17, %v265_v16  ;;  %v1008_v21 = vpack.c.bf16 (!%p797_p6), %v284_v19, %v283_v18  ;;  %v268_v23 = vld [vmem:[%s1474_s1 + $0x38] sm:$0xff] (!%p797_p6)  ;;  %v285_v24 = vld [vmem:[%s1474_s1 + $0xc0] sm:$0xff] (!%p797_p6)  ;;  %v286_v25 = vld [vmem:[%s1474_s1 + $0xc8] sm:$0xff] (!%p797_p6)  ;;  %923 = vmatprep.mubr.msk.f32.mxu1 (!%p797_p6), %vm1186_vm0, %v1187_v12 }
  0x17   : > { %v798_v26 = vld.sshfl [vmem:[%s1248_s26] sm:$0x33 pattern:$0x76325410]  ;;  %v436_v29 = vld [vmem:[%s1476_s3 + $0x8] sm:$0xff]  ;;  %v437_v30 = vld [vmem:[%s1476_s3 + $0x10] sm:$0xff]  ;;  %v1010_v31 = vpack.c.bf16 %v268_v23, %v267_v22  ;;  %v1012_v34 = vpack.c.bf16 %v286_v25, %v285_v24 }
  0x18   : > { %v301_v27 = vcombine.high %v798_v26, %v798_v26  ;;  %v435_v28 = vld [vmem:[%s1476_s3] sm:$0xff]  ;;  %v438_v33 = vld [vmem:[%s1476_s3 + $0x18] sm:$0xff]  ;;  %v270_v36 = vld [vmem:[%s1474_s1 + $0x48] sm:$0xff] }
  0x19   : > { %1003 = vmatpush3.bf16.msra.mxu0 %v1002_v14  ;;  %v1321_v32 = vpack.c.bf16 %v436_v29, %v435_v28  ;;  %v269_v35 = vld [vmem:[%s1474_s1 + $0x40] sm:$0xff]  ;;  %v287_v37 = vld [vmem:[%s1474_s1 + $0xd0] sm:$0xff]  ;;  %v288_v38 = vld [vmem:[%s1474_s1 + $0xd8] sm:$0xff]  ;;  %v1339_v39 = vpack.c.bf16 %v438_v33, %v437_v30 }
  0x1a   : > { %1005 = vmatprep.subr.bf16.mxu0 %v1004_v15  ;;  %368 = vmatprep.mubr.f32.mxu0 %v301_v27  ;;  %v1014_v40 = vpack.c.bf16 %v270_v36, %v269_v35  ;;  %v1016_v41 = vpack.c.bf16 %v288_v38, %v287_v37  ;;  %v271_v42 = vld [vmem:[%s1474_s1 + $0x50] sm:$0xff]  ;;  %v272_v43 = vld [vmem:[%s1474_s1 + $0x58] sm:$0xff]  ;;  %v289_v44 = vld [vmem:[%s1474_s1 + $0xe0] sm:$0xff] }
  0x1b   : > { %1030 = vmatpush3.bf16.msra.mxu1 %v1321_v32  ;;  %v290_v45 = vld [vmem:[%s1474_s1 + $0xe8] sm:$0xff]  ;;  %v1018_v46 = vpack.c.bf16 %v272_v43, %v271_v42  ;;  %v273_v48 = vld [vmem:[%s1474_s1 + $0x60] sm:$0xff]  ;;  %v291_v50 = vld [vmem:[%s1474_s1 + $0xf0] sm:$0xff] }
  0x1c   : > { %1031 = vmatprep.subr.bf16.mxu1 %v1185_v7  ;;  %v1020_v47 = vpack.c.bf16 %v290_v45, %v289_v44  ;;  %v274_v49 = vld [vmem:[%s1474_s1 + $0x68] sm:$0xff]  ;;  %v292_v51 = vld [vmem:[%s1474_s1 + $0xf8] sm:$0xff]  ;;  %v275_v54 = vld [vmem:[%s1474_s1 + $0x70] sm:$0xff] }
  0x1d   : > { %1007 = vmatpush3.bf16.msra.mxu0 %v1006_v20  ;;  %v1022_v52 = vpack.c.bf16 %v274_v49, %v273_v48  ;;  %v1024_v53 = vpack.c.bf16 %v292_v51, %v291_v50  ;;  %v276_v55 = vld [vmem:[%s1474_s1 + $0x78] sm:$0xff]  ;;  %v439_v57 = vld [vmem:[%s1476_s3 + $0x20] sm:$0xff]  ;;  %v440_v58 = vld [vmem:[%s1476_s3 + $0x28] sm:$0xff] }
  0x1e   : > { %1009 = vmatprep.subr.bf16.mxu0 %v1008_v21  ;;  %v1026_v56 = vpack.c.bf16 %v276_v55, %v275_v54  ;;  %v1385_v59 = vpack.c.bf16 %v440_v58, %v439_v57  ;;  %v441_v60 = vld [vmem:[%s1476_s3 + $0x30] sm:$0xff]  ;;  %v442_v61 = vld [vmem:[%s1476_s3 + $0x38] sm:$0xff]  ;;  %v443_v63 = vld [vmem:[%s1476_s3 + $0x40] sm:$0xff] }
  0x1f   : > { %1033 = vmatpush3.bf16.msra.mxu1 %v1339_v39  ;;  %v1397_v62 = vpack.c.bf16 %v442_v61, %v441_v60  ;;  %v444_v0 = vld [vmem:[%s1476_s3 + $0x48] sm:$0xff]  ;;  %v445_v2 = vld [vmem:[%s1476_s3 + $0x50] sm:$0xff]  ;;  %v446_v3 = vld [vmem:[%s1476_s3 + $0x58] sm:$0xff] }
  0x20   : > { %1034 = vmatprep.subr.bf16.mxu1 %v1185_v7  ;;  %v1409_v1 = vpack.c.bf16 %v444_v0, %v443_v63  ;;  %v1044_v4 = vpack.c.bf16 %v446_v3, %v445_v2  ;;  %v447_v5 = vld [vmem:[%s1476_s3 + $0x60] sm:$0xff]  ;;  %v448_v6 = vld [vmem:[%s1476_s3 + $0x68] sm:$0xff]  ;;  %v449_v9 = vld [vmem:[%s1476_s3 + $0x70] sm:$0xff] }
  0x21   : > { %1011 = vmatpush3.bf16.msra.mxu0 %v1010_v31  ;;  %v1047_v8 = vpack.c.bf16 %v448_v6, %v447_v5  ;;  %v450_v10 = vld [vmem:[%s1476_s3 + $0x78] sm:$0xff] }
  0x22   : > { %1013 = vmatprep.subr.bf16.mxu0 %v1012_v34  ;;  %v1050_v11 = vpack.c.bf16 %v450_v10, %v449_v9 }
  0x23   : > { %1036 = vmatpush3.bf16.msra.mxu1 %v1385_v59 }
  0x24   : > { %1037 = vmatprep.subr.bf16.mxu1 %v1185_v7 }
  0x25   : > { %1015 = vmatpush3.bf16.msra.mxu0 %v1014_v40 }
  0x26   : > { %1017 = vmatprep.subr.bf16.mxu0 %v1016_v41 }
  0x27   : > { %1039 = vmatpush3.bf16.msra.mxu1 %v1397_v62 }
  0x28   : > { %1040 = vmatprep.subr.bf16.mxu1 %v1185_v7 }
  0x29   : > { %1019 = vmatpush3.bf16.msra.mxu0 %v1018_v46 }
  0x2a   : > { %1021 = vmatprep.subr.bf16.mxu0 %v1020_v47 }
  0x2b   : > { %1042 = vmatpush3.bf16.msra.mxu1 %v1409_v1 }
  0x2c   : > { %1043 = vmatprep.subr.bf16.mxu1 %v1185_v7 }
  0x2d   : > { %1023 = vmatpush3.bf16.msra.mxu0 %v1022_v52 }
  0x2e   : > { %1025 = vmatprep.subr.bf16.mxu0 %v1024_v53 }
  0x2f   : > { %1045 = vmatpush3.bf16.msra.mxu1 %v1044_v4 }
  0x30   : > { %1046 = vmatprep.subr.bf16.mxu1 %v1185_v7 }
  0x31   : > { %1027 = vmatpush3.bf16.msra.mxu0 %v1026_v56 }
  0x32   : > { %1052 = vmatprep.subr.bf16.mxu0 %v1185_v7 }
  0x33   : > { %1048 = vmatpush3.bf16.msra.mxu1 %v1047_v8 }
  0x34   : > { %369 = vmatmul.mubr.f32.vlgmr.msra.gmra.mrb[0].mxu0 %v798_v26  ;;  %1049 = vmatprep.subr.bf16.mxu1 %v1185_v7 }
  0x35   : > { %1054 = vmatpush3.bf16.msra.mxu0 %v1321_v32  ;;  %958 = vmatprep.mubr.msk.f32.mxu0 %vm1186_vm0, %v1187_v12 }
  0x36   : > { %1055 = vmatprep.subr.bf16.mxu0 %v1185_v7 }
  0x37   : > { %1051 = vmatpush3.bf16.msra.mxu1 %v1050_v11 }
  0x38   : > { %1076 = vmatprep.subr.bf16.mxu1 %v1185_v7 }
  0x39   : > { %1057 = vmatpush3.bf16.msra.mxu0 %v1339_v39 }
  0x3a   : > { %1058 = vmatprep.subr.bf16.mxu0 %v1185_v7 }
  0x3d   : > { %1060 = vmatpush3.bf16.msra.mxu0 %v1385_v59 }
  0x3e   : > { %1061 = vmatprep.subr.bf16.mxu0 %v1185_v7 }
  0x41   : > { %1063 = vmatpush3.bf16.msra.mxu0 %v1397_v62 }
  0x42   : > { %1064 = vmatprep.subr.bf16.mxu0 %v1185_v7 }
  0x45   : > { %1066 = vmatpush3.bf16.msra.mxu0 %v1409_v1 }
  0x46   : > { %1067 = vmatprep.subr.bf16.mxu0 %v1185_v7 }
  0x49   : > { %1069 = vmatpush3.bf16.msra.mxu0 %v1044_v4 }
  0x4a   : > { %1070 = vmatprep.subr.bf16.mxu0 %v1185_v7 }
  0x4d   : > { %1072 = vmatpush3.bf16.msra.mxu0 %v1047_v8 }
  0x4e   : > { %1073 = vmatprep.subr.bf16.mxu0 %v1185_v7 }
  0x51   : > { %1075 = vmatpush3.bf16.msra.mxu0 %v1050_v11 }
 0x107   : > { %v837_v13 = vpop.f32.mrb[0].mxu0 }
 0x108   : > { %v838_v14 = vpop.f32.mrb[1].mxu0 }
 0x109   : > { %v839_v15 = vadd.f32 %v838_v14, %v837_v13 }
 0x10b   : > { %374 = vst [vmem:[#allocation2] sm:$0x3] %v839_v15  ;;  %v376_v16 = vsel %vm375_vm1, %v839_v15, 0.0 }
 0x10c   : > { %v377_v17 = vrot.slane %v376_v16, 4 }
 0x10e   : > { %v378_v18 = vadd.f32 %v377_v17, %v376_v16 }
 0x110   : > { %v379_v19 = vrot.slane %v378_v18, 2 }
 0x112   : > { %v380_v20 = vadd.f32 %v379_v19, %v378_v18 }
 0x114   : > { %v381_v21 = vrot.slane %v380_v20, 1 }
 0x116   : > { %v382_v22 = vadd.f32 %v381_v21, %v380_v20 }
 0x118   : > { %v384_v23 = vmul.f32 0.5, %v382_v22 }
 0x11a   : > { %v385_v24 = vsub.f32 %v839_v15, %v384_v23  ;;  %398 = vst [vmem:[#allocation3] sm:$0x1] %v384_v23 }
 0x11c   : > { %v386_v25 = vmul.f32 %v385_v24, %v385_v24 }
 0x11e   : > { %v387_v26 = vsel %vm375_vm1, %v386_v25, 0.0 }
 0x11f   : > { %v388_v27 = vrot.slane %v387_v26, 4 }
 0x121   : > { %v389_v28 = vadd.f32 %v388_v27, %v387_v26  ;;  %v432_v29 = vld [vmem:[#allocation3] sm:$0x1] }
 0x122   : > { %924 = vmatmul.mubr.f32.vlgmr.msra.gmra.mrb[0].mxu1 %v432_v29 }
 0x123   : > { %v390_v30 = vrot.slane %v389_v28, 2  ;;  %1078 = vmatpush3.bf16.msra.mxu1 %v1321_v32  ;;  %993 = vmatprep.mubr.msk.f32.mxu1 %vm1186_vm0, %v1187_v12 }
 0x124   : > { %1079 = vmatprep.subr.bf16.mxu1 %v1185_v7 }
 0x125   : > { %v391_v31 = vadd.f32 %v390_v30, %v389_v28 }
 0x127   : > { %v392_v33 = vrot.slane %v391_v31, 1  ;;  %1081 = vmatpush3.bf16.msra.mxu1 %v1339_v39 }
 0x128   : > { %1082 = vmatprep.subr.bf16.mxu1 %v1185_v7 }
 0x129   : > { %v393_v34 = vadd.f32 %v392_v33, %v391_v31 }
 0x12b   : > { %399 = vst [vmem:[#allocation4] sm:$0x1] %v393_v34  ;;  %1084 = vmatpush3.bf16.msra.mxu1 %v1385_v59 }
 0x12c   : > { %1085 = vmatprep.subr.bf16.mxu1 %v1185_v7 }
 0x12f   : > { %1087 = vmatpush3.bf16.msra.mxu1 %v1397_v62 }
 0x130   : > { %1088 = vmatprep.subr.bf16.mxu1 %v1185_v7 }
 0x132   : > { %v433_v32 = vld [vmem:[#allocation4] sm:$0x1] }
 0x133   : > { %1090 = vmatpush3.bf16.msra.mxu1 %v1409_v1 }
 0x134   : > { %1091 = vmatprep.subr.bf16.mxu1 %v1185_v7 }
 0x137   : > { %1093 = vmatpush3.bf16.msra.mxu1 %v1044_v4 }
 0x138   : > { %1094 = vmatprep.subr.bf16.mxu1 %v1185_v7 }
 0x13b   : > { %1096 = vmatpush3.bf16.msra.mxu1 %v1047_v8 }
 0x13c   : > { %1097 = vmatprep.subr.bf16.mxu1 %v1185_v7  ;;  %v434_v7 = vld [vmem:[%s1475_s2] sm:$0x3] }
 0x13f   : > { %1099 = vmatpush3.bf16.msra.mxu1 %v1050_v11 }
 0x142   : > { %994 = vmatmul.mubr.f32.vlgmr.msra.gmra.mrb[2].mxu1 %v433_v32 }
 0x1f5   : > { %v517_v35 = vpop.f32.mrb[0].mxu1 }
 0x1f6   : > { %v522_v36 = vmul.f32 0.125, %v517_v35  ;;  %v925_v37 = vpop.f32.mrb[1].mxu1 }
 0x1f8   : > { %v523_v38 = vsub.f32 %v432_v29, %v522_v36 }
 0x1fa   : > { %v524_v39 = vmul.f32 %v523_v38, %v523_v38 }
 0x1fc   : > { %959 = vmatmul.mubr.f32.vlgmr.msra.gmra.mrb[2].mxu0 %v524_v39 }
 0x215   : > { %v662_v40 = vpop.f32.mrb[2].mxu1 }
 0x216   : > { %v995_v41 = vpop.f32.mrb[3].mxu1 }
 0x2cf   : > { %v591_v42 = vpop.f32.mrb[2].mxu0 }
 0x2d0   : > { %v595_v43 = vmul.f32 2.0, %v591_v42  ;;  %v960_v44 = vpop.f32.mrb[3].mxu0 }
 0x2d2   : > { %v663_v45 = vadd.f32 %v662_v40, %v595_v43 }
 0x2d4   : > { %v667_v46 = vmul.f32 0.0625, %v663_v45 }
 0x2d6   : > { %v668_v47 = vadd.f32 1e-05, %v667_v46 }
 0x2d8   : > { %1143 = vrsqrt.f32 %v668_v47 }
 0x2e2   : > { %v1144_v48 = vpop.eup %1143 }
 0x2e3   : > { %v670_v49 = vmul.f32 %v1144_v48, %v434_v7 }
 0x2e5   : > { %v671_v50 = vmul.f32 %v670_v49, %v522_v36  ;;  %676 = vst [vmem:[#allocation5] sm:$0x1] %v670_v49 }
 0x2e7   : > { %v673_v51 = vrot.slane %v671_v50, 7 }
 0x2e9   : > { %v675_v52 = vsub.f32 %v434_v7, %v673_v51 }
 0x2eb   : > { %677 = vst [vmem:[#allocation5] sm:$0x2] %v675_v52 }
 0x2ec PF: > { %p799_p7 = scmp.ne.s32.totalorder %s1167_s15, 1 }
 0x2ed   : > { %v682_v53 = vld [vmem:[#allocation2] sm:$0x3] (!%p799_p7)  ;;  %v800_v54 = vld [vmem:[#allocation5] ss:$0 sm:$0xff] (!%p799_p7) }
 0x2ee   : > { %681 = sbr.rel (%p799_p7) target bundleno = 761 (0x2f9), region = 56  ;;  %v688_v56 = vmul.f32 (!%p799_p7), %v800_v54, %v682_v53 }
 0x2f2   : > { %v801_v55 = vld [vmem:[#allocation5 + $0x1] ss:$0 sm:$0xff] (!%p799_p7) }
 0x2f3   : > { %v694_v57 = vadd.f32 (!%p799_p7), %v801_v55, %v688_v56 }
 0x2f5   : > { %vm695_vm2 = vcmp.ge.f32.partialorder %v694_v57, 0.0  ;;  %v696_v58 = vmul.f32 0.3, %v694_v57 }
 0x2f7   : > { %v697_v59 = vsel %vm695_vm2, %v694_v57, %v696_v58 }
 0x2f8   : > { %698 = vst [vmem:[%s1253_s29] sm:$0x3] %v697_v59 }
 0x2f9 PF: > { %s14_s19 = sadd.s32 1, %s1183_s19   ;;  %s1478_s15 = smov %s1175_s17 }
 0x2fa   : > { %p11_p8 = scmp.ge.s32.totalorder %s14_s19, 6   ;;  %s1479_s16 = smov %s1179_s18 }
 0x2fb   : > { %s1480_s17 = smov %s1483_s20  ;;  %s1481_s18 = smov %s1487_s21 }
 0x2fc   :  { %13 = sbr.rel (!%p11_p8) target bundleno = 3 (0x3), region = 86 }

// kernel: _lambda_.5
= control target key start
LH: loop header
LB: loop body
LE: loop exit
PB: predicated region body
PF: predicated region fallthrough
CT: control target
= control target key end

     0   :  { %s1167_s15 = smov 0   ;;  %s1169_s16 = smov 0   ;;  %s1437_s0 = inlined_call_operand.vmem [shape: f32[2,1,256], index: 0, kind: input, shape index: {}]   ;;  %s1438_s1 = inlined_call_operand.vmem [shape: f32[256,128], index: 1, kind: input, shape index: {}]   ;;  %s1439_s2 = inlined_call_operand.vmem [shape: f32[2,128], index: 2, kind: input, shape index: {}]   ;;  %s1440_s3 = inlined_call_operand.vmem [shape: f32[128,128], index: 3, kind: input, shape index: {}]   ;;  %s1441_s4 = inlined_call_operand.vmem [shape: f32[2,1,128], index: 4, kind: output, shape index: {}]  }
   0x1   :  { %s1171_s17 = smov 0   ;;  %s1173_s18 = smov 0  }
   0x2   :  { %s1175_s19 = smov 0  }
   0x3 LB: > { %s29_s20 = sadd.s32 1, %s1129_s17  ;;  %s33_s21 = sadd.s32 1, %s1133_s18  ;;  %s1137_s19 = sphi %s1175_s19, %s14_s19   ;;  %s1133_s18 = sphi %s1173_s18, %s1445_s18   ;;  %s1129_s17 = sphi %s1171_s17, %s1444_s17   ;;  %s1125_s16 = sphi %s1169_s16, %s1443_s16   ;;  %s1121_s15 = sphi %s1167_s15, %s1442_s15  }
   0x4   : > { %p31_p0 = scmp.ge.s32.totalorder %s29_s20, 2  ;;  %p751_p1 = scmp.ge.s32.totalorder %s1137_s19, 1 }
   0x5   : > { %p198_p2 = scmp.lt.s32.totalorder %s1137_s19, 5 }
   0x6   : > { %s1447_s20 = smov (%p31_p0, %s29_s20), 0  ;;  %s1449_s21 = smov (!%p31_p0, %s33_s21), %s1133_s18 }
   0x7   : > { %p199_p3 = pnand %p751_p1, %p198_p2  ;;  %p35_p4 = scmp.ge.s32.totalorder %s1449_s21, 2 }
   0x8   : > { %p233_p5 = scmp.lt.s32.totalorder (!%p199_p3), %s1125_s16, 1  ;;  %p753_p6 = scmp.ne.s32.totalorder (!%p199_p3), %s1121_s15, 0 }
   0x9   : > { %s1451_s21 = smov (%p35_p4, %s1449_s21), 0  ;;  %202 = sbr.rel (%p199_p3) target bundleno = 774 (0x306), region = 36 }
  0x10   : > { %s1453_s16 = smov (!%p233_p5, %s1125_s16), 1  ;;  %254 = sbr.rel (%p753_p6) target bundleno = 761 (0x2f9), region = 40 }
  0x11   : > { %s752_s22 = sshll.u32 %s1453_s16, 1  ;;  %s249_s25 = scalar_lea.vmem %s1441_s4, %s1453_s16  ;;  %v272_v0 = vld [vmem:[%s1438_s1 + $0x80] sm:$0xff] (!%p753_p6)  ;;  %v273_v1 = vld [vmem:[%s1438_s1 + $0x88] sm:$0xff] (!%p753_p6)  ;;  %v289_v3 = vlaneseq (!%p753_p6)  ;;  %v274_v6 = vld [vmem:[%s1438_s1 + $0x90] sm:$0xff] (!%p753_p6)  ;;  %v1139_v8 = vmov (!%p753_p6), 0.0|0.0   ;;  %vm1140_vm0 = vmmov (!%p753_p6), 0  }
  0x12   : > { %s1209_s28 = scalar_lea.vmem %s1437_s0, %s752_s22  ;;  %v256_v2 = vld [vmem:[%s1438_s1] sm:$0xff] (!%p753_p6)  ;;  %v948_v4 = vpack.c.bf16 (!%p753_p6), %v273_v1, %v272_v0  ;;  %v257_v5 = vld [vmem:[%s1438_s1 + $0x8] sm:$0xff] (!%p753_p6)  ;;  %v275_v7 = vld [vmem:[%s1438_s1 + $0x98] sm:$0xff] (!%p753_p6)  ;;  %1004 = vmatprep.subr.bf16.mxu0 (!%p753_p6), %v1139_v8 }
  0x13   : > { %v950_v9 = vpack.c.bf16 (!%p753_p6), %v257_v5, %v256_v2  ;;  %v952_v10 = vpack.c.bf16 (!%p753_p6), %v275_v7, %v274_v6  ;;  %v258_v11 = vld [vmem:[%s1438_s1 + $0x10] sm:$0xff] (!%p753_p6)  ;;  %v259_v12 = vld [vmem:[%s1438_s1 + $0x18] sm:$0xff] (!%p753_p6)  ;;  %v276_v13 = vld [vmem:[%s1438_s1 + $0xa0] sm:$0xff] (!%p753_p6)  ;;  %v1243_v15 = vshrl.u32 (!%p753_p6), %v289_v3, 7 }
  0x14   : > { %949 = vmatprep.subr.bf16.mxu1 (!%p753_p6), %v948_v4  ;;  %v277_v14 = vld [vmem:[%s1438_s1 + $0xa8] sm:$0xff] (!%p753_p6)  ;;  %v954_v16 = vpack.c.bf16 (!%p753_p6), %v259_v12, %v258_v11  ;;  %v260_v18 = vld [vmem:[%s1438_s1 + $0x20] sm:$0xff] (!%p753_p6)  ;;  %v278_v20 = vld [vmem:[%s1438_s1 + $0xb0] sm:$0xff] (!%p753_p6) }
  0x15   : > { %951 = vmatpush3.bf16.msra.mxu1 (!%p753_p6), %v950_v9  ;;  %v956_v17 = vpack.c.bf16 (!%p753_p6), %v277_v14, %v276_v13  ;;  %v261_v19 = vld [vmem:[%s1438_s1 + $0x28] sm:$0xff] (!%p753_p6)  ;;  %v279_v21 = vld [vmem:[%s1438_s1 + $0xb8] sm:$0xff] (!%p753_p6)  ;;  %v295_v22 = vsub.s32 (!%p753_p6), 1, %v1243_v15  ;;  %v262_v25 = vld [vmem:[%s1438_s1 + $0x30] sm:$0xff] (!%p753_p6)  ;;  %v291_v3 = vsub.s32 (!%p753_p6), 0, %v1243_v15 }
  0x16   : > { %953 = vmatprep.subr.bf16.mxu1 (!%p753_p6), %v952_v10  ;;  %v958_v23 = vpack.c.bf16 (!%p753_p6), %v261_v19, %v260_v18  ;;  %v960_v24 = vpack.c.bf16 (!%p753_p6), %v279_v21, %v278_v20  ;;  %v263_v26 = vld [vmem:[%s1438_s1 + $0x38] sm:$0xff] (!%p753_p6)  ;;  %v280_v27 = vld [vmem:[%s1438_s1 + $0xc0] sm:$0xff] (!%p753_p6)  ;;  %v281_v28 = vld [vmem:[%s1438_s1 + $0xc8] sm:$0xff] (!%p753_p6) }
  0x17   : > { %v255_v29 = vld [vmem:[%s1209_s28] sm:$0x3]  ;;  %v413_v32 = vld [vmem:[%s1440_s3 + $0x8] sm:$0xff]  ;;  %v962_v33 = vpack.c.bf16 %v263_v26, %v262_v25  ;;  %v964_v36 = vpack.c.bf16 %v281_v28, %v280_v27  ;;  %v414_v38 = vld [vmem:[%s1440_s3 + $0x10] sm:$0xff] }
  0x18   : > { %v296_v30 = vrot.slane %v255_v29, %v295_v22  ;;  %v412_v31 = vld [vmem:[%s1440_s3] sm:$0xff]  ;;  %v265_v37 = vld [vmem:[%s1438_s1 + $0x48] sm:$0xff]  ;;  %v415_v39 = vld [vmem:[%s1440_s3 + $0x18] sm:$0xff]  ;;  %v292_v6 = vrot.slane %v255_v29, %v291_v3 }
  0x19   : > { %955 = vmatpush3.bf16.msra.mxu1 %v954_v16  ;;  %v264_v34 = vld [vmem:[%s1438_s1 + $0x40] sm:$0xff]  ;;  %v1280_v35 = vpack.c.bf16 %v413_v32, %v412_v31  ;;  %v282_v40 = vld [vmem:[%s1438_s1 + $0xd0] sm:$0xff]  ;;  %v283_v41 = vld [vmem:[%s1438_s1 + $0xd8] sm:$0xff]  ;;  %v1302_v44 = vpack.c.bf16 %v415_v39, %v414_v38 }
  0x1a   : > { %957 = vmatprep.subr.bf16.mxu1 %v956_v17  ;;  %363 = vmatprep.mubr.f32.mxu1 %v296_v30  ;;  %v966_v42 = vpack.c.bf16 %v265_v37, %v264_v34  ;;  %v266_v43 = vld [vmem:[%s1438_s1 + $0x50] sm:$0xff]  ;;  %v968_v45 = vpack.c.bf16 %v283_v41, %v282_v40  ;;  %v267_v46 = vld [vmem:[%s1438_s1 + $0x58] sm:$0xff]  ;;  %v416_v47 = vld [vmem:[%s1440_s3 + $0x20] sm:$0xff]  ;;  %v1141_v17 = vmov 0.0  }
  0x1b   : > { %1006 = vmatpush3.bf16.msra.mxu0 %v1280_v35  ;;  %v417_v48 = vld [vmem:[%s1440_s3 + $0x28] sm:$0xff]  ;;  %v284_v49 = vld [vmem:[%s1438_s1 + $0xe0] sm:$0xff]  ;;  %v970_v51 = vpack.c.bf16 %v267_v46, %v266_v43  ;;  %v418_v56 = vld [vmem:[%s1440_s3 + $0x30] sm:$0xff]  ;;  %910 = vmatprep.mubr.msk.f32.mxu0 %vm1140_vm0, %v1141_v17 }
  0x1c   : > { %1007 = vmatprep.subr.bf16.mxu0 %v1139_v8  ;;  %v285_v50 = vld [vmem:[%s1438_s1 + $0xe8] sm:$0xff]  ;;  %v268_v52 = vld [vmem:[%s1438_s1 + $0x60] sm:$0xff]  ;;  %v1324_v53 = vpack.c.bf16 %v417_v48, %v416_v47  ;;  %v419_v57 = vld [vmem:[%s1440_s3 + $0x38] sm:$0xff] }
  0x1d   : > { %959 = vmatpush3.bf16.msra.mxu1 %v958_v23  ;;  %v972_v54 = vpack.c.bf16 %v285_v50, %v284_v49  ;;  %v269_v55 = vld [vmem:[%s1438_s1 + $0x68] sm:$0xff]  ;;  %v286_v58 = vld [vmem:[%s1438_s1 + $0xf0] sm:$0xff]  ;;  %v287_v59 = vld [vmem:[%s1438_s1 + $0xf8] sm:$0xff]  ;;  %v1346_v62 = vpack.c.bf16 %v419_v57, %v418_v56 }
  0x1e   : > { %961 = vmatprep.subr.bf16.mxu1 %v960_v24  ;;  %v974_v60 = vpack.c.bf16 %v269_v55, %v268_v52  ;;  %v270_v61 = vld [vmem:[%s1438_s1 + $0x70] sm:$0xff]  ;;  %v976_v63 = vpack.c.bf16 %v287_v59, %v286_v58  ;;  %v271_v0 = vld [vmem:[%s1438_s1 + $0x78] sm:$0xff]  ;;  %v420_v1 = vld [vmem:[%s1440_s3 + $0x40] sm:$0xff] }
  0x1f   : > { %1009 = vmatpush3.bf16.msra.mxu0 %v1302_v44  ;;  %v421_v2 = vld [vmem:[%s1440_s3 + $0x48] sm:$0xff]  ;;  %v978_v4 = vpack.c.bf16 %v271_v0, %v270_v61  ;;  %v422_v7 = vld [vmem:[%s1440_s3 + $0x50] sm:$0xff]  ;;  %v423_v9 = vld [vmem:[%s1440_s3 + $0x58] sm:$0xff] }
  0x20   : > { %1010 = vmatprep.subr.bf16.mxu0 %v1139_v8  ;;  %v1360_v5 = vpack.c.bf16 %v421_v2, %v420_v1  ;;  %v996_v10 = vpack.c.bf16 %v423_v9, %v422_v7  ;;  %v424_v11 = vld [vmem:[%s1440_s3 + $0x60] sm:$0xff]  ;;  %v425_v12 = vld [vmem:[%s1440_s3 + $0x68] sm:$0xff]  ;;  %v426_v14 = vld [vmem:[%s1440_s3 + $0x70] sm:$0xff] }
  0x21   : > { %963 = vmatpush3.bf16.msra.mxu1 %v962_v33  ;;  %v999_v13 = vpack.c.bf16 %v425_v12, %v424_v11  ;;  %v427_v15 = vld [vmem:[%s1440_s3 + $0x78] sm:$0xff]  ;;  %v411_v34 = vld [vmem:[%s1439_s2] sm:$0x3] }
  0x22   : > { %965 = vmatprep.subr.bf16.mxu1 %v964_v36  ;;  %v1002_v16 = vpack.c.bf16 %v427_v15, %v426_v14 }
  0x23   : > { %1012 = vmatpush3.bf16.msra.mxu0 %v1324_v53 }
  0x24   : > { %1013 = vmatprep.subr.bf16.mxu0 %v1139_v8 }
  0x25   : > { %967 = vmatpush3.bf16.msra.mxu1 %v966_v42 }
  0x26   : > { %969 = vmatprep.subr.bf16.mxu1 %v968_v45 }
  0x27   : > { %1015 = vmatpush3.bf16.msra.mxu0 %v1346_v62 }
  0x28   : > { %1016 = vmatprep.subr.bf16.mxu0 %v1139_v8 }
  0x29   : > { %971 = vmatpush3.bf16.msra.mxu1 %v970_v51 }
  0x2a   : > { %973 = vmatprep.subr.bf16.mxu1 %v972_v54 }
  0x2b   : > { %1018 = vmatpush3.bf16.msra.mxu0 %v1360_v5 }
  0x2c   : > { %1019 = vmatprep.subr.bf16.mxu0 %v1139_v8 }
  0x2d   : > { %975 = vmatpush3.bf16.msra.mxu1 %v974_v60 }
  0x2e   : > { %977 = vmatprep.subr.bf16.mxu1 %v976_v63 }
  0x2f   : > { %1021 = vmatpush3.bf16.msra.mxu0 %v996_v10 }
  0x30   : > { %1022 = vmatprep.subr.bf16.mxu0 %v1139_v8 }
  0x31   : > { %979 = vmatpush3.bf16.msra.mxu1 %v978_v4 }
  0x32   : > { %980 = vmatprep.subr.bf16.mxu1 %v1139_v8 }
  0x33   : > { %1024 = vmatpush3.bf16.msra.mxu0 %v999_v13 }
  0x34   : > { %364 = vmatmul.mubr.f32.vlgmr.msra.gmra.mrb[0].mxu1 %v292_v6  ;;  %1025 = vmatprep.subr.bf16.mxu0 %v1139_v8 }
  0x35   : > { %982 = vmatpush3.bf16.msra.mxu1 %v1280_v35  ;;  %875 = vmatprep.mubr.msk.f32.mxu1 %vm1140_vm0, %v1141_v17 }
  0x36   : > { %983 = vmatprep.subr.bf16.mxu1 %v1139_v8 }
  0x37   : > { %1027 = vmatpush3.bf16.msra.mxu0 %v1002_v16 }
  0x38   : > { %1028 = vmatprep.subr.bf16.mxu0 %v1139_v8 }
  0x39   : > { %985 = vmatpush3.bf16.msra.mxu1 %v1302_v44 }
  0x3a   : > { %986 = vmatprep.subr.bf16.mxu1 %v1139_v8 }
  0x3d   : > { %988 = vmatpush3.bf16.msra.mxu1 %v1324_v53 }
  0x3e   : > { %989 = vmatprep.subr.bf16.mxu1 %v1139_v8 }
  0x41   : > { %991 = vmatpush3.bf16.msra.mxu1 %v1346_v62 }
  0x42   : > { %992 = vmatprep.subr.bf16.mxu1 %v1139_v8 }
  0x45   : > { %994 = vmatpush3.bf16.msra.mxu1 %v1360_v5 }
  0x46   : > { %995 = vmatprep.subr.bf16.mxu1 %v1139_v8 }
  0x49   : > { %997 = vmatpush3.bf16.msra.mxu1 %v996_v10 }
  0x4a   : > { %998 = vmatprep.subr.bf16.mxu1 %v1139_v8 }
  0x4d   : > { %1000 = vmatpush3.bf16.msra.mxu1 %v999_v13 }
  0x4e   : > { %1001 = vmatprep.subr.bf16.mxu1 %v1139_v8 }
  0x51   : > { %1003 = vmatpush3.bf16.msra.mxu1 %v1002_v16 }
 0x107   : > { %v789_v18 = vpop.f32.mrb[0].mxu1 }
 0x108   : > { %v790_v19 = vpop.f32.mrb[1].mxu1 }
 0x109   : > { %v791_v20 = vadd.f32 %v790_v19, %v789_v18 }
 0x10b   : > { %369 = vst [vmem:[#allocation2] sm:$0x1] %v791_v20  ;;  %v371_v21 = vsub.f32 %v791_v20, %v791_v20  ;;  %378 = vst [vmem:[#allocation3] sm:$0x1] %v791_v20 }
 0x10d   : > { %v372_v22 = vmul.f32 %v371_v21, %v371_v21 }
 0x10f   : > { %379 = vst [vmem:[#allocation4] sm:$0x1] %v372_v22 }
 0x112   : > { %v409_v23 = vld [vmem:[#allocation3] sm:$0x1] }
 0x113   : > { %876 = vmatmul.mubr.f32.vlgmr.msra.gmra.mrb[2].mxu1 %v409_v23 }
 0x116   : > { %v410_v29 = vld [vmem:[#allocation4] sm:$0x1] }
 0x1e6   : > { %v494_v24 = vpop.f32.mrb[2].mxu1 }
 0x1e7   : > { %v499_v25 = vmul.f32 0.25, %v494_v24  ;;  %v877_v26 = vpop.f32.mrb[3].mxu1 }
 0x1e9   : > { %v500_v27 = vsub.f32 %v409_v23, %v499_v25 }
 0x1eb   : > { %v501_v28 = vmul.f32 %v500_v27, %v500_v27 }
 0x1ed   : > { %911 = vmatmul.mubr.f32.vlgmr.msra.gmra.mrb[0].mxu0 %v501_v28 }
 0x1ee   : > { %1030 = vmatpush3.bf16.msra.mxu0 %v1280_v35  ;;  %945 = vmatprep.mubr.msk.f32.mxu0 %vm1140_vm0, %v1141_v17 }
 0x1ef   : > { %1031 = vmatprep.subr.bf16.mxu0 %v1139_v8 }
 0x1f2   : > { %1033 = vmatpush3.bf16.msra.mxu0 %v1302_v44 }
 0x1f3   : > { %1034 = vmatprep.subr.bf16.mxu0 %v1139_v8 }
 0x1f6   : > { %1036 = vmatpush3.bf16.msra.mxu0 %v1324_v53 }
 0x1f7   : > { %1037 = vmatprep.subr.bf16.mxu0 %v1139_v8 }
 0x1fa   : > { %1039 = vmatpush3.bf16.msra.mxu0 %v1346_v62 }
 0x1fb   : > { %1040 = vmatprep.subr.bf16.mxu0 %v1139_v8 }
 0x1fe   : > { %1042 = vmatpush3.bf16.msra.mxu0 %v1360_v5 }
 0x1ff   : > { %1043 = vmatprep.subr.bf16.mxu0 %v1139_v8 }
 0x202   : > { %1045 = vmatpush3.bf16.msra.mxu0 %v996_v10 }
 0x203   : > { %1046 = vmatprep.subr.bf16.mxu0 %v1139_v8 }
 0x206   : > { %1048 = vmatpush3.bf16.msra.mxu0 %v999_v13 }
 0x207   : > { %1049 = vmatprep.subr.bf16.mxu0 %v1139_v8 }
 0x20a   : > { %1051 = vmatpush3.bf16.msra.mxu0 %v1002_v16 }
 0x20d   : > { %946 = vmatmul.mubr.f32.vlgmr.msra.gmra.mrb[0].mxu0 %v410_v29 }
 0x2e0   : > { %v638_v30 = vpop.f32.mrb[0].mxu0 }
 0x2e1   : > { %v642_v31 = vmul.f32 0.25, %v638_v30  ;;  %v947_v32 = vpop.f32.mrb[1].mxu0 }
 0x2e3   : > { %v643_v33 = vadd.f32 1e-05, %v642_v31 }
 0x2e5   : > { %1097 = vrsqrt.f32 %v643_v33 }
 0x2ef   : > { %v1098_v35 = vpop.eup %1097 }
 0x2f0   : > { %v645_v36 = vmul.f32 %v1098_v35, %v411_v34 }
 0x2f2   : > { %v646_v37 = vmul.f32 %v645_v36, %v499_v25  ;;  %651 = vst [vmem:[#allocation5] sm:$0x1] %v645_v36 }
 0x2f4   : > { %v648_v38 = vrot.slane %v646_v37, 7 }
 0x2f6   : > { %v650_v39 = vsub.f32 %v411_v34, %v648_v38 }
 0x2f8   : > { %652 = vst [vmem:[#allocation5] sm:$0x2] %v650_v39 }
 0x2f9 PF: > { %p754_p7 = scmp.ne.s32.totalorder %s1121_s15, 1 }
 0x2fa   : > { %v657_v8 = vld [vmem:[#allocation2] sm:$0x1] (!%p754_p7)  ;;  %v658_v40 = vld [vmem:[#allocation5] sm:$0x1] (!%p754_p7) }
 0x2fb   : > { %656 = sbr.rel (%p754_p7) target bundleno = 774 (0x306), region = 56  ;;  %v659_v42 = vmul.f32 (!%p754_p7), %v658_v40, %v657_v8 }
 0x2ff   : > { %v660_v41 = vld [vmem:[#allocation5 + $0x1] sm:$0x1] (!%p754_p7) }
 0x300   : > { %v661_v43 = vadd.f32 (!%p754_p7), %v660_v41, %v659_v42 }
 0x302   : > { %vm662_vm1 = vcmp.ge.f32.partialorder %v661_v43, 0.0  ;;  %v663_v44 = vmul.f32 0.3, %v661_v43 }
 0x304   : > { %v664_v45 = vsel %vm662_vm1, %v661_v43, %v663_v44 }
 0x305   : > { %665 = vst [vmem:[%s249_s25] sm:$0x1] %v664_v45 }
 0x306 PF: > { %s14_s19 = sadd.s32 1, %s1137_s19   ;;  %s1442_s15 = smov %s1129_s17 }
 0x307   : > { %p11_p8 = scmp.ge.s32.totalorder %s14_s19, 6   ;;  %s1443_s16 = smov %s1133_s18 }
 0x308   : > { %s1444_s17 = smov %s1447_s20  ;;  %s1445_s18 = smov %s1451_s21 }
 0x309   :  { %13 = sbr.rel (!%p11_p8) target bundleno = 3 (0x3), region = 86 }

</bundles_post_ra>
